<compile_context>
chip_gen: v6e
topology: v6e:2x2x1
jax: 0.10.0
libtpu: 0.0.40
codegen_flags: <defaults>
</compile_context>

<pallas_src>
from functools import partial

import jax
import jax.numpy as jnp
from jax import lax
from jax.experimental import pallas as pl
from jax.experimental.pallas import tpu as pltpu

OUT_PAD = 128  # lane-dense output width; sliced back to output_size in the wrapper


def _lstm_kernel(num_layers, hidden, in_feat, t_blk,
                 x_ref, w_ref, b_ref, wfc_ref, bfc_ref,
                 out_ref, z_sc, c_sc):
    """One grid step == T_BLK timesteps; all layers updated per timestep.

    z_sc[l, :, 0:H]  : input to layer l (layer 0: x_t in lanes [0:F), zeros in [F:H))
    z_sc[l, :, H:2H] : h state of layer l
    c_sc[l]          : c state of layer l
    """
    L, H, F = num_layers, hidden, in_feat
    B = z_sc.shape[1]
    blk = pl.program_id(0)

    @pl.when(blk == 0)
    def _():
        z_sc[...] = jnp.zeros_like(z_sc)   # also zeroes the x pad lanes [F:H) of layer 0
        c_sc[...] = jnp.zeros_like(c_sc)

    # Hoist bias broadcasts out of the time loop (JAX does not CSE broadcast_in_dim).
    biases = [jnp.broadcast_to(b_ref[l], (B, 4 * H)) for l in range(L)]

    def step(tt, carry):
        # layer-0 input: lanes [0:F) <- x_t ; lanes [F:H) stay zero.
        z_sc[0, :, 0:F] = x_ref[tt]
        for l in range(L):                                   # static unroll (small L)
            z = z_sc[l]                                      # (B, 2H) = [input | h_prev]
            gates = (jnp.dot(z.astype(jnp.bfloat16), w_ref[l],
                             preferred_element_type=jnp.float32)
                     + biases[l])                            # (B, 4H), PyTorch order i,f,g,o
            sg = jax.nn.sigmoid(gates)                       # one full-width pass
            tg = jnp.tanh(gates)                             # one full-width pass
            i_g = sg[:, 0:H]
            f_g = sg[:, H:2 * H]
            o_g = sg[:, 3 * H:4 * H]
            g_g = tg[:, 2 * H:3 * H]
            c_new = f_g * c_sc[l] + i_g * g_g                # f32 elementwise
            h_new = o_g * jnp.tanh(c_new)
            c_sc[l] = c_new
            z_sc[l, :, H:2 * H] = h_new                      # own recurrent state
            if l + 1 < L:
                z_sc[l + 1, :, 0:H] = h_new                  # feeds next layer
        return carry

    lax.fori_loop(0, t_blk, step, 0, unroll=True)

    # fc(out[:, -1, :]) only on the last grid step (output block is resident across time).
    @pl.when(blk == pl.num_programs(0) - 1)
    def _():
        h_top = z_sc[L - 1, :, H:2 * H]
        out_ref[...] = (jnp.dot(h_top.astype(jnp.bfloat16), wfc_ref[...],
                                preferred_element_type=jnp.float32)
                        + bfc_ref[...])


def _pick_time_block(seq_len, target=8):
    t = min(target, seq_len)
    while seq_len % t:
        t -= 1
    return t


def temperature_lstm(x, packed, *, hidden_size, num_layers, output_size, time_block=8):
    """x: (batch, seq, input_size) f32 -> (batch, output_size) f32."""
    if x.ndim != 3:
        raise ValueError(
            f"Expected input with 3 dimensions (batch, seq, features), got {x.ndim}")
    w_fused, b, w_fc, b_fc = packed
    B, S, F = x.shape
    H = hidden_size
    assert F <= H, "kernel packs layer-0 input into the hidden-width input slot"

    t_blk = _pick_time_block(S, time_block)
    n_blk = S // t_blk
    x_tm = jnp.transpose(x, (1, 0, 2))            # (S, B, F) time-major, UNPADDED

    kernel = partial(_lstm_kernel, num_layers, H, F, t_blk)
    out_padded = pl.pallas_call(
        kernel,
        out_shape=jax.ShapeDtypeStruct((B, OUT_PAD), jnp.float32),
        grid_spec=pltpu.PrefetchScalarGridSpec(
            num_scalar_prefetch=0,
            grid=(n_blk,),
            in_specs=[
                pl.BlockSpec((t_blk, B, F), lambda i: (i, 0, 0)),               # x time block
                pl.BlockSpec((num_layers, 2 * H, 4 * H), lambda i: (0, 0, 0)),  # [Wih^T;Whh^T] bf16
                pl.BlockSpec((num_layers, 1, 4 * H), lambda i: (0, 0, 0)),      # b_ih + b_hh  f32
                pl.BlockSpec((H, OUT_PAD), lambda i: (0, 0)),                   # fc weight^T  bf16
                pl.BlockSpec((1, OUT_PAD), lambda i: (0, 0)),                   # fc bias      f32
            ],
            out_specs=pl.BlockSpec((B, OUT_PAD), lambda i: (0, 0)),
            scratch_shapes=[
                pltpu.VMEM((num_layers, B, 2 * H), jnp.float32),  # [layer input | h] per layer
                pltpu.VMEM((num_layers, B, H), jnp.float32),      # c state
            ],
        ),
        compiler_params=pltpu.CompilerParams(
            # Recurrence over time -> the single grid axis must stay "arbitrary".
            # (A leading "parallel" batch axis would be the way to use v7x's 2nd TC at large B.)
            dimension_semantics=("arbitrary",),
            vmem_limit_bytes=32 * 1024 * 1024,
        ),
    )(x_tm, w_fused, b, w_fc, b_fc)
    return out_padded[:, :output_size]


def init_params(key, input_size, hidden_size, num_layers, output_size):
    """uniform(-1/sqrt(H), 1/sqrt(H)) init mirroring nn.LSTM / nn.Linear shapes."""
    H, F = hidden_size, input_size
    k = 1.0 / float(H) ** 0.5
    keys = jax.random.split(key, 4 * num_layers + 2)

    raw = []  # per-layer (w_ih (4H,in), w_hh (4H,H), b_ih (4H,), b_hh (4H,))
    for l in range(num_layers):
        in_l = F if l == 0 else H
        w_ih = jax.random.uniform(keys[4 * l + 0], (4 * H, in_l), jnp.float32, -k, k)
        w_hh = jax.random.uniform(keys[4 * l + 1], (4 * H, H), jnp.float32, -k, k)
        b_ih = jax.random.uniform(keys[4 * l + 2], (4 * H,), jnp.float32, -k, k)
        b_hh = jax.random.uniform(keys[4 * l + 3], (4 * H,), jnp.float32, -k, k)
        raw.append((w_ih, w_hh, b_ih, b_hh))

    fc_w = jax.random.uniform(keys[-2], (output_size, H), jnp.float32, -k, k)
    fc_b = jax.random.uniform(keys[-1], (output_size,), jnp.float32, -k, k)

    # Fused per-layer weight [W_ih^T ; W_hh^T] -> (L, 2H, 4H) bf16.  Layer-0 W_ih^T is
    # zero-padded along its input dim (F -> H); the matching input lanes stay zero in-kernel.
    fused = []
    for (w_ih, w_hh, _, _) in raw:
        w_ih_t = jnp.pad(w_ih.T, ((0, H - w_ih.shape[1]), (0, 0)))   # (H, 4H)
        fused.append(jnp.concatenate([w_ih_t, w_hh.T], axis=0))      # (2H, 4H)
    w_fused = jnp.stack(fused).astype(jnp.bfloat16)                  # (L, 2H, 4H)
    b = jnp.stack([(b_ih + b_hh)[None, :] for (_, _, b_ih, b_hh) in raw])  # (L,1,4H) f32

    # Lane-dense fc weights: padded columns are zero and sliced off in the wrapper.
    w_fc = jnp.zeros((H, OUT_PAD), jnp.float32).at[:, :output_size].set(fc_w.T)
    w_fc = w_fc.astype(jnp.bfloat16)
    b_fc = jnp.zeros((1, OUT_PAD), jnp.float32).at[:, :output_size].set(fc_b[None, :])

    packed = (w_fused, b, w_fc, b_fc)
    return packed, raw, (fc_w, fc_b)


def reference_forward(x, raw, fc, hidden_size, num_layers, *, weights_in_bf16=False):
    """Pure-JAX replica of the PyTorch forward (optionally mirroring bf16 weights)."""
    B, S, _ = x.shape
    H = hidden_size
    fc_w, fc_b = fc
    wd = jnp.bfloat16 if weights_in_bf16 else jnp.float32
    h = [jnp.zeros((B, H), jnp.float32) for _ in range(num_layers)]
    c = [jnp.zeros((B, H), jnp.float32) for _ in range(num_layers)]
    for t in range(S):
        inp = x[:, t, :]
        for l in range(num_layers):
            w_ih, w_hh, b_ih, b_hh = raw[l]
            gates = (jnp.dot(inp.astype(wd), w_ih.T.astype(wd),
                             preferred_element_type=jnp.float32)
                     + jnp.dot(h[l].astype(wd), w_hh.T.astype(wd),
                               preferred_element_type=jnp.float32)
                     + b_ih + b_hh)
            i_g = jax.nn.sigmoid(gates[:, 0:H])
            f_g = jax.nn.sigmoid(gates[:, H:2 * H])
            g_g = jnp.tanh(gates[:, 2 * H:3 * H])
            o_g = jax.nn.sigmoid(gates[:, 3 * H:4 * H])
            c[l] = f_g * c[l] + i_g * g_g
            h[l] = o_g * jnp.tanh(c[l])
            inp = h[l]
    return (jnp.dot(h[-1].astype(wd), fc_w.T.astype(wd),
                    preferred_element_type=jnp.float32) + fc_b)


if __name__ == "__main__":
    INPUT_SIZE = 4
    HIDDEN_SIZE = 32
    NUM_LAYERS = 2
    OUTPUT_SIZE = 1
    BATCH = 2
    SEQ = 16          # two time blocks of 8 -> exercises cross-grid-step state carry

    key = jax.random.PRNGKey(0)
    k_x, k_p = jax.random.split(key)
    x = jax.random.normal(k_x, (BATCH, SEQ, INPUT_SIZE), jnp.float32)

    packed, raw, fc = init_params(k_p, INPUT_SIZE, HIDDEN_SIZE, NUM_LAYERS, OUTPUT_SIZE)

    out = temperature_lstm(x, packed, hidden_size=HIDDEN_SIZE, num_layers=NUM_LAYERS,
                           output_size=OUTPUT_SIZE)
    out = jax.block_until_ready(out)
    assert out.shape == (BATCH, OUTPUT_SIZE)

    # Tight check vs. a reference that mirrors the kernel's bf16-weight / f32-accumulate dots.
    ref_bf16 = reference_forward(x, raw, fc, HIDDEN_SIZE, NUM_LAYERS, weights_in_bf16=True)
    assert jnp.allclose(out, ref_bf16, atol=1e-3, rtol=1e-3), (out, ref_bf16)

    # Looser sanity check vs. the full-f32 PyTorch-equivalent forward.
    ref_f32 = reference_forward(x, raw, fc, HIDDEN_SIZE, NUM_LAYERS, weights_in_bf16=False)
    assert jnp.allclose(out, ref_f32, atol=5e-2, rtol=5e-2), (out, ref_f32)

    print("KERNEL_OK")
</pallas_src>

<mosaic_0001>
module attributes {stable_mosaic.version = 11 : i64} {
  func.func @_lstm_kernel(%arg0: i32, %arg1: memref<8x2x4xf32, #tpu.memory_space<vmem>>, %arg2: memref<2x64x128xbf16, #tpu.memory_space<vmem>>, %arg3: memref<2x1x128xf32, #tpu.memory_space<vmem>>, %arg4: memref<32x128xbf16, #tpu.memory_space<vmem>>, %arg5: memref<1x128xf32, #tpu.memory_space<vmem>>, %arg6: memref<2x128xf32, #tpu.memory_space<vmem>>, %arg7: memref<2x2x64xf32, #tpu.memory_space<vmem>>, %arg8: memref<2x2x32xf32, #tpu.memory_space<vmem>>) attributes {dimension_semantics = [#tpu.dimension_semantics<arbitrary>], iteration_bounds = array<i64: 2>, scalar_prefetch = 0 : i64, scratch_operands = 2 : i64, tpu.core_type = #tpu.core_type<tc>, window_params = [{transform_indices = @transform_0, window_bounds = array<i64: 8, 2, 4>}, {pipeline_mode = #tpu.pipeline_mode<synchronous>, transform_indices = @transform_1, window_bounds = array<i64: 2, 64, 128>}, {pipeline_mode = #tpu.pipeline_mode<synchronous>, transform_indices = @transform_2, window_bounds = array<i64: 2, 1, 128>}, {pipeline_mode = #tpu.pipeline_mode<synchronous>, transform_indices = @transform_3, window_bounds = array<i64: 32, 128>}, {pipeline_mode = #tpu.pipeline_mode<synchronous>, transform_indices = @transform_4, window_bounds = array<i64: 1, 128>}, {pipeline_mode = #tpu.pipeline_mode<synchronous>, transform_indices = @transform_5, window_bounds = array<i64: 2, 128>}]} {
    %c0_i32 = arith.constant 0 : i32
    %0 = arith.cmpi eq, %arg0, %c0_i32 : i32
    %1 = arith.extui %0 : i1 to i32
    %c0_i32_0 = arith.constant 0 : i32
    %2 = arith.cmpi ne, %1, %c0_i32_0 : i32
    scf.if %2 {
      %cst_342 = arith.constant 0.000000e+00 : f32
      %566 = vector.broadcast %cst_342 : f32 to vector<2x2x64xf32>
      %c0_343 = arith.constant 0 : index
      %c0_344 = arith.constant 0 : index
      %c0_345 = arith.constant 0 : index
      %567 = vector.load %arg7[%c0_343, %c0_344, %c0_345] : memref<2x2x64xf32, #tpu.memory_space<vmem>>, vector<2x2x64xf32>
      tpu.vector_store %arg7[%c0_343, %c0_344, %c0_345], %566 {strides = array<i32>} : memref<2x2x64xf32, #tpu.memory_space<vmem>>, vector<2x2x64xf32>,
      %cst_346 = arith.constant 0.000000e+00 : f32
      %568 = vector.broadcast %cst_346 : f32 to vector<2x2x32xf32>
      %c0_347 = arith.constant 0 : index
      %c0_348 = arith.constant 0 : index
      %c0_349 = arith.constant 0 : index
      %569 = vector.load %arg8[%c0_347, %c0_348, %c0_349] : memref<2x2x32xf32, #tpu.memory_space<vmem>>, vector<2x2x32xf32>
      tpu.vector_store %arg8[%c0_347, %c0_348, %c0_349], %568 {strides = array<i32>} : memref<2x2x32xf32, #tpu.memory_space<vmem>>, vector<2x2x32xf32>,
    } else {
    }
    %c0 = arith.constant 0 : index
    %c0_1 = arith.constant 0 : index
    %c0_2 = arith.constant 0 : index
    %3 = vector.load %arg3[%c0, %c0_1, %c0_2] : memref<2x1x128xf32, #tpu.memory_space<vmem>>, vector<1x1x128xf32>
    %4 = vector.shape_cast %3 : vector<1x1x128xf32> to vector<1x128xf32>
    %5 = vector.shape_cast %4 : vector<1x128xf32> to vector<1x128xf32>
    %6 = vector.broadcast %5 : vector<1x128xf32> to vector<2x128xf32>
    %c1 = arith.constant 1 : index
    %c0_3 = arith.constant 0 : index
    %c0_4 = arith.constant 0 : index
    %7 = vector.load %arg3[%c1, %c0_3, %c0_4] : memref<2x1x128xf32, #tpu.memory_space<vmem>>, vector<1x1x128xf32>
    %8 = vector.shape_cast %7 : vector<1x1x128xf32> to vector<1x128xf32>
    %9 = vector.shape_cast %8 : vector<1x128xf32> to vector<1x128xf32>
    %10 = vector.broadcast %9 : vector<1x128xf32> to vector<2x128xf32>
    %c0_i32_5 = arith.constant 0 : i32
    %11 = arith.index_cast %c0_i32_5 : i32 to index
    %c0_6 = arith.constant 0 : index
    %c0_7 = arith.constant 0 : index
    %12 = vector.load %arg1[%11, %c0_6, %c0_7] : memref<8x2x4xf32, #tpu.memory_space<vmem>>, vector<1x2x4xf32>
    %13 = vector.shape_cast %12 : vector<1x2x4xf32> to vector<2x4xf32>
    %c0_8 = arith.constant 0 : index
    %c0_9 = arith.constant 0 : index
    %c0_10 = arith.constant 0 : index
    %14 = vector.load %arg7[%c0_8, %c0_9, %c0_10] : memref<2x2x64xf32, #tpu.memory_space<vmem>>, vector<1x2x4xf32>
    %15 = vector.shape_cast %14 : vector<1x2x4xf32> to vector<2x4xf32>
    %16 = vector.shape_cast %13 : vector<2x4xf32> to vector<1x2x4xf32>
    tpu.vector_store %arg7[%c0_8, %c0_9, %c0_10], %16 {strides = array<i32>} : memref<2x2x64xf32, #tpu.memory_space<vmem>>, vector<1x2x4xf32>,
    %c0_11 = arith.constant 0 : index
    %c0_12 = arith.constant 0 : index
    %c0_13 = arith.constant 0 : index
    %17 = vector.load %arg7[%c0_11, %c0_12, %c0_13] : memref<2x2x64xf32, #tpu.memory_space<vmem>>, vector<1x2x64xf32>
    %18 = vector.shape_cast %17 : vector<1x2x64xf32> to vector<2x64xf32>
    %19 = arith.truncf %18 : vector<2x64xf32> to vector<2x64xbf16>
    %c0_14 = arith.constant 0 : index
    %c0_15 = arith.constant 0 : index
    %c0_16 = arith.constant 0 : index
    %20 = vector.load %arg2[%c0_14, %c0_15, %c0_16] : memref<2x64x128xbf16, #tpu.memory_space<vmem>>, vector<1x64x128xbf16>
    %21 = vector.shape_cast %20 : vector<1x64x128xbf16> to vector<64x128xbf16>
    %cst = arith.constant dense<0.000000e+00> : vector<2x128xf32>
    %22 = tpu.matmul %19, %21, %cst {dimension_numbers = #tpu.dot_dimension_numbers<[1], [0], [0], [1], [0, 0, 1, 1], [], []>} : vector<2x64xbf16>, vector<64x128xbf16>, vector<2x128xf32> -> vector<2x128xf32>
    %23 = arith.addf %22, %6 : vector<2x128xf32>
    %24 = arith.negf %23 : vector<2x128xf32>
    %25 = math.exp %24 : vector<2x128xf32>
    %cst_17 = arith.constant 1.000000e+00 : f32
    %26 = vector.broadcast %cst_17 : f32 to vector<2x128xf32>
    %27 = arith.addf %26, %25 : vector<2x128xf32>
    %28 = arith.divf %26, %27 : vector<2x128xf32>
    %29 = math.tanh %23 : vector<2x128xf32>
    %30 = vector.extract_strided_slice %28 {offsets = [0, 0], sizes = [2, 32], strides = [1, 1]} : vector<2x128xf32> to vector<2x32xf32>
    %31 = vector.extract_strided_slice %28 {offsets = [0, 32], sizes = [2, 32], strides = [1, 1]} : vector<2x128xf32> to vector<2x32xf32>
    %32 = vector.extract_strided_slice %28 {offsets = [0, 96], sizes = [2, 32], strides = [1, 1]} : vector<2x128xf32> to vector<2x32xf32>
    %33 = vector.extract_strided_slice %29 {offsets = [0, 64], sizes = [2, 32], strides = [1, 1]} : vector<2x128xf32> to vector<2x32xf32>
    %c0_18 = arith.constant 0 : index
    %c0_19 = arith.constant 0 : index
    %c0_20 = arith.constant 0 : index
    %34 = vector.load %arg8[%c0_18, %c0_19, %c0_20] : memref<2x2x32xf32, #tpu.memory_space<vmem>>, vector<1x2x32xf32>
    %35 = vector.shape_cast %34 : vector<1x2x32xf32> to vector<2x32xf32>
    %36 = arith.mulf %31, %35 : vector<2x32xf32>
    %37 = arith.mulf %30, %33 : vector<2x32xf32>
    %38 = arith.addf %36, %37 : vector<2x32xf32>
    %39 = math.tanh %38 : vector<2x32xf32>
    %40 = arith.mulf %32, %39 : vector<2x32xf32>
    %c0_21 = arith.constant 0 : index
    %c0_22 = arith.constant 0 : index
    %c0_23 = arith.constant 0 : index
    %41 = vector.load %arg8[%c0_21, %c0_22, %c0_23] : memref<2x2x32xf32, #tpu.memory_space<vmem>>, vector<1x2x32xf32>
    %42 = vector.shape_cast %41 : vector<1x2x32xf32> to vector<2x32xf32>
    %43 = vector.shape_cast %38 : vector<2x32xf32> to vector<1x2x32xf32>
    tpu.vector_store %arg8[%c0_21, %c0_22, %c0_23], %43 {strides = array<i32>} : memref<2x2x32xf32, #tpu.memory_space<vmem>>, vector<1x2x32xf32>,
    %c0_24 = arith.constant 0 : index
    %c0_25 = arith.constant 0 : index
    %c32 = arith.constant 32 : index
    %44 = vector.load %arg7[%c0_24, %c0_25, %c32] : memref<2x2x64xf32, #tpu.memory_space<vmem>>, vector<1x2x32xf32>
    %45 = vector.shape_cast %44 : vector<1x2x32xf32> to vector<2x32xf32>
    %46 = vector.shape_cast %40 : vector<2x32xf32> to vector<1x2x32xf32>
    tpu.vector_store %arg7[%c0_24, %c0_25, %c32], %46 {strides = array<i32>} : memref<2x2x64xf32, #tpu.memory_space<vmem>>, vector<1x2x32xf32>,
    %c1_26 = arith.constant 1 : index
    %c0_27 = arith.constant 0 : index
    %c0_28 = arith.constant 0 : index
    %47 = vector.load %arg7[%c1_26, %c0_27, %c0_28] : memref<2x2x64xf32, #tpu.memory_space<vmem>>, vector<1x2x32xf32>
    %48 = vector.shape_cast %47 : vector<1x2x32xf32> to vector<2x32xf32>
    %49 = vector.shape_cast %40 : vector<2x32xf32> to vector<1x2x32xf32>
    tpu.vector_store %arg7[%c1_26, %c0_27, %c0_28], %49 {strides = array<i32>} : memref<2x2x64xf32, #tpu.memory_space<vmem>>, vector<1x2x32xf32>,
    %c1_29 = arith.constant 1 : index
    %c0_30 = arith.constant 0 : index
    %c0_31 = arith.constant 0 : index
    %50 = vector.load %arg7[%c1_29, %c0_30, %c0_31] : memref<2x2x64xf32, #tpu.memory_space<vmem>>, vector<1x2x64xf32>
    %51 = vector.shape_cast %50 : vector<1x2x64xf32> to vector<2x64xf32>
    %52 = arith.truncf %51 : vector<2x64xf32> to vector<2x64xbf16>
    %c1_32 = arith.constant 1 : index
    %c0_33 = arith.constant 0 : index
    %c0_34 = arith.constant 0 : index
    %53 = vector.load %arg2[%c1_32, %c0_33, %c0_34] : memref<2x64x128xbf16, #tpu.memory_space<vmem>>, vector<1x64x128xbf16>
    %54 = vector.shape_cast %53 : vector<1x64x128xbf16> to vector<64x128xbf16>
    %cst_35 = arith.constant dense<0.000000e+00> : vector<2x128xf32>
    %55 = tpu.matmul %52, %54, %cst_35 {dimension_numbers = #tpu.dot_dimension_numbers<[1], [0], [0], [1], [0, 0, 1, 1], [], []>} : vector<2x64xbf16>, vector<64x128xbf16>, vector<2x128xf32> -> vector<2x128xf32>
    %56 = arith.addf %55, %10 : vector<2x128xf32>
    %57 = arith.negf %56 : vector<2x128xf32>
    %58 = math.exp %57 : vector<2x128xf32>
    %cst_36 = arith.constant 1.000000e+00 : f32
    %59 = vector.broadcast %cst_36 : f32 to vector<2x128xf32>
    %60 = arith.addf %59, %58 : vector<2x128xf32>
    %61 = arith.divf %59, %60 : vector<2x128xf32>
    %62 = math.tanh %56 : vector<2x128xf32>
    %63 = vector.extract_strided_slice %61 {offsets = [0, 0], sizes = [2, 32], strides = [1, 1]} : vector<2x128xf32> to vector<2x32xf32>
    %64 = vector.extract_strided_slice %61 {offsets = [0, 32], sizes = [2, 32], strides = [1, 1]} : vector<2x128xf32> to vector<2x32xf32>
    %65 = vector.extract_strided_slice %61 {offsets = [0, 96], sizes = [2, 32], strides = [1, 1]} : vector<2x128xf32> to vector<2x32xf32>
    %66 = vector.extract_strided_slice %62 {offsets = [0, 64], sizes = [2, 32], strides = [1, 1]} : vector<2x128xf32> to vector<2x32xf32>
    %c1_37 = arith.constant 1 : index
    %c0_38 = arith.constant 0 : index
    %c0_39 = arith.constant 0 : index
    %67 = vector.load %arg8[%c1_37, %c0_38, %c0_39] : memref<2x2x32xf32, #tpu.memory_space<vmem>>, vector<1x2x32xf32>
    %68 = vector.shape_cast %67 : vector<1x2x32xf32> to vector<2x32xf32>
    %69 = arith.mulf %64, %68 : vector<2x32xf32>
    %70 = arith.mulf %63, %66 : vector<2x32xf32>
    %71 = arith.addf %69, %70 : vector<2x32xf32>
    %72 = math.tanh %71 : vector<2x32xf32>
    %73 = arith.mulf %65, %72 : vector<2x32xf32>
    %c1_40 = arith.constant 1 : index
    %c0_41 = arith.constant 0 : index
    %c0_42 = arith.constant 0 : index
    %74 = vector.load %arg8[%c1_40, %c0_41, %c0_42] : memref<2x2x32xf32, #tpu.memory_space<vmem>>, vector<1x2x32xf32>
    %75 = vector.shape_cast %74 : vector<1x2x32xf32> to vector<2x32xf32>
    %76 = vector.shape_cast %71 : vector<2x32xf32> to vector<1x2x32xf32>
    tpu.vector_store %arg8[%c1_40, %c0_41, %c0_42], %76 {strides = array<i32>} : memref<2x2x32xf32, #tpu.memory_space<vmem>>, vector<1x2x32xf32>,
    %c1_43 = arith.constant 1 : index
    %c0_44 = arith.constant 0 : index
    %c32_45 = arith.constant 32 : index
    %77 = vector.load %arg7[%c1_43, %c0_44, %c32_45] : memref<2x2x64xf32, #tpu.memory_space<vmem>>, vector<1x2x32xf32>
    %78 = vector.shape_cast %77 : vector<1x2x32xf32> to vector<2x32xf32>
    %79 = vector.shape_cast %73 : vector<2x32xf32> to vector<1x2x32xf32>
    tpu.vector_store %arg7[%c1_43, %c0_44, %c32_45], %79 {strides = array<i32>} : memref<2x2x64xf32, #tpu.memory_space<vmem>>, vector<1x2x32xf32>,
    %c1_i32 = arith.constant 1 : i32
    %80 = arith.index_cast %c1_i32 : i32 to index
    %c0_46 = arith.constant 0 : index
    %c0_47 = arith.constant 0 : index
    %81 = vector.load %arg1[%80, %c0_46, %c0_47] : memref<8x2x4xf32, #tpu.memory_space<vmem>>, vector<1x2x4xf32>
    %82 = vector.shape_cast %81 : vector<1x2x4xf32> to vector<2x4xf32>
    %c0_48 = arith.constant 0 : index
    %c0_49 = arith.constant 0 : index
    %c0_50 = arith.constant 0 : index
    %83 = vector.load %arg7[%c0_48, %c0_49, %c0_50] : memref<2x2x64xf32, #tpu.memory_space<vmem>>, vector<1x2x4xf32>
    %84 = vector.shape_cast %83 : vector<1x2x4xf32> to vector<2x4xf32>
    %85 = vector.shape_cast %82 : vector<2x4xf32> to vector<1x2x4xf32>
    tpu.vector_store %arg7[%c0_48, %c0_49, %c0_50], %85 {strides = array<i32>} : memref<2x2x64xf32, #tpu.memory_space<vmem>>, vector<1x2x4xf32>,
    %c0_51 = arith.constant 0 : index
    %c0_52 = arith.constant 0 : index
    %c0_53 = arith.constant 0 : index
    %86 = vector.load %arg7[%c0_51, %c0_52, %c0_53] : memref<2x2x64xf32, #tpu.memory_space<vmem>>, vector<1x2x64xf32>
    %87 = vector.shape_cast %86 : vector<1x2x64xf32> to vector<2x64xf32>
    %88 = arith.truncf %87 : vector<2x64xf32> to vector<2x64xbf16>
    %c0_54 = arith.constant 0 : index
    %c0_55 = arith.constant 0 : index
    %c0_56 = arith.constant 0 : index
    %89 = vector.load %arg2[%c0_54, %c0_55, %c0_56] : memref<2x64x128xbf16, #tpu.memory_space<vmem>>, vector<1x64x128xbf16>
    %90 = vector.shape_cast %89 : vector<1x64x128xbf16> to vector<64x128xbf16>
    %cst_57 = arith.constant dense<0.000000e+00> : vector<2x128xf32>
    %91 = tpu.matmul %88, %90, %cst_57 {dimension_numbers = #tpu.dot_dimension_numbers<[1], [0], [0], [1], [0, 0, 1, 1], [], []>} : vector<2x64xbf16>, vector<64x128xbf16>, vector<2x128xf32> -> vector<2x128xf32>
    %92 = arith.addf %91, %6 : vector<2x128xf32>
    %93 = arith.negf %92 : vector<2x128xf32>
    %94 = math.exp %93 : vector<2x128xf32>
    %cst_58 = arith.constant 1.000000e+00 : f32
    %95 = vector.broadcast %cst_58 : f32 to vector<2x128xf32>
    %96 = arith.addf %95, %94 : vector<2x128xf32>
    %97 = arith.divf %95, %96 : vector<2x128xf32>
    %98 = math.tanh %92 : vector<2x128xf32>
    %99 = vector.extract_strided_slice %97 {offsets = [0, 0], sizes = [2, 32], strides = [1, 1]} : vector<2x128xf32> to vector<2x32xf32>
    %100 = vector.extract_strided_slice %97 {offsets = [0, 32], sizes = [2, 32], strides = [1, 1]} : vector<2x128xf32> to vector<2x32xf32>
    %101 = vector.extract_strided_slice %97 {offsets = [0, 96], sizes = [2, 32], strides = [1, 1]} : vector<2x128xf32> to vector<2x32xf32>
    %102 = vector.extract_strided_slice %98 {offsets = [0, 64], sizes = [2, 32], strides = [1, 1]} : vector<2x128xf32> to vector<2x32xf32>
    %c0_59 = arith.constant 0 : index
    %c0_60 = arith.constant 0 : index
    %c0_61 = arith.constant 0 : index
    %103 = vector.load %arg8[%c0_59, %c0_60, %c0_61] : memref<2x2x32xf32, #tpu.memory_space<vmem>>, vector<1x2x32xf32>
    %104 = vector.shape_cast %103 : vector<1x2x32xf32> to vector<2x32xf32>
    %105 = arith.mulf %100, %104 : vector<2x32xf32>
    %106 = arith.mulf %99, %102 : vector<2x32xf32>
    %107 = arith.addf %105, %106 : vector<2x32xf32>
    %108 = math.tanh %107 : vector<2x32xf32>
    %109 = arith.mulf %101, %108 : vector<2x32xf32>
    %c0_62 = arith.constant 0 : index
    %c0_63 = arith.constant 0 : index
    %c0_64 = arith.constant 0 : index
    %110 = vector.load %arg8[%c0_62, %c0_63, %c0_64] : memref<2x2x32xf32, #tpu.memory_space<vmem>>, vector<1x2x32xf32>
    %111 = vector.shape_cast %110 : vector<1x2x32xf32> to vector<2x32xf32>
    %112 = vector.shape_cast %107 : vector<2x32xf32> to vector<1x2x32xf32>
    tpu.vector_store %arg8[%c0_62, %c0_63, %c0_64], %112 {strides = array<i32>} : memref<2x2x32xf32, #tpu.memory_space<vmem>>, vector<1x2x32xf32>,
    %c0_65 = arith.constant 0 : index
    %c0_66 = arith.constant 0 : index
    %c32_67 = arith.constant 32 : index
    %113 = vector.load %arg7[%c0_65, %c0_66, %c32_67] : memref<2x2x64xf32, #tpu.memory_space<vmem>>, vector<1x2x32xf32>
    %114 = vector.shape_cast %113 : vector<1x2x32xf32> to vector<2x32xf32>
    %115 = vector.shape_cast %109 : vector<2x32xf32> to vector<1x2x32xf32>
    tpu.vector_store %arg7[%c0_65, %c0_66, %c32_67], %115 {strides = array<i32>} : memref<2x2x64xf32, #tpu.memory_space<vmem>>, vector<1x2x32xf32>,
    %c1_68 = arith.constant 1 : index
    %c0_69 = arith.constant 0 : index
    %c0_70 = arith.constant 0 : index
    %116 = vector.load %arg7[%c1_68, %c0_69, %c0_70] : memref<2x2x64xf32, #tpu.memory_space<vmem>>, vector<1x2x32xf32>
    %117 = vector.shape_cast %116 : vector<1x2x32xf32> to vector<2x32xf32>
    %118 = vector.shape_cast %109 : vector<2x32xf32> to vector<1x2x32xf32>
    tpu.vector_store %arg7[%c1_68, %c0_69, %c0_70], %118 {strides = array<i32>} : memref<2x2x64xf32, #tpu.memory_space<vmem>>, vector<1x2x32xf32>,
    %c1_71 = arith.constant 1 : index
    %c0_72 = arith.constant 0 : index
    %c0_73 = arith.constant 0 : index
    %119 = vector.load %arg7[%c1_71, %c0_72, %c0_73] : memref<2x2x64xf32, #tpu.memory_space<vmem>>, vector<1x2x64xf32>
    %120 = vector.shape_cast %119 : vector<1x2x64xf32> to vector<2x64xf32>
    %121 = arith.truncf %120 : vector<2x64xf32> to vector<2x64xbf16>
    %c1_74 = arith.constant 1 : index
    %c0_75 = arith.constant 0 : index
    %c0_76 = arith.constant 0 : index
    %122 = vector.load %arg2[%c1_74, %c0_75, %c0_76] : memref<2x64x128xbf16, #tpu.memory_space<vmem>>, vector<1x64x128xbf16>
    %123 = vector.shape_cast %122 : vector<1x64x128xbf16> to vector<64x128xbf16>
    %cst_77 = arith.constant dense<0.000000e+00> : vector<2x128xf32>
    %124 = tpu.matmul %121, %123, %cst_77 {dimension_numbers = #tpu.dot_dimension_numbers<[1], [0], [0], [1], [0, 0, 1, 1], [], []>} : vector<2x64xbf16>, vector<64x128xbf16>, vector<2x128xf32> -> vector<2x128xf32>
    %125 = arith.addf %124, %10 : vector<2x128xf32>
    %126 = arith.negf %125 : vector<2x128xf32>
    %127 = math.exp %126 : vector<2x128xf32>
    %cst_78 = arith.constant 1.000000e+00 : f32
    %128 = vector.broadcast %cst_78 : f32 to vector<2x128xf32>
    %129 = arith.addf %128, %127 : vector<2x128xf32>
    %130 = arith.divf %128, %129 : vector<2x128xf32>
    %131 = math.tanh %125 : vector<2x128xf32>
    %132 = vector.extract_strided_slice %130 {offsets = [0, 0], sizes = [2, 32], strides = [1, 1]} : vector<2x128xf32> to vector<2x32xf32>
    %133 = vector.extract_strided_slice %130 {offsets = [0, 32], sizes = [2, 32], strides = [1, 1]} : vector<2x128xf32> to vector<2x32xf32>
    %134 = vector.extract_strided_slice %130 {offsets = [0, 96], sizes = [2, 32], strides = [1, 1]} : vector<2x128xf32> to vector<2x32xf32>
    %135 = vector.extract_strided_slice %131 {offsets = [0, 64], sizes = [2, 32], strides = [1, 1]} : vector<2x128xf32> to vector<2x32xf32>
    %c1_79 = arith.constant 1 : index
    %c0_80 = arith.constant 0 : index
    %c0_81 = arith.constant 0 : index
    %136 = vector.load %arg8[%c1_79, %c0_80, %c0_81] : memref<2x2x32xf32, #tpu.memory_space<vmem>>, vector<1x2x32xf32>
    %137 = vector.shape_cast %136 : vector<1x2x32xf32> to vector<2x32xf32>
    %138 = arith.mulf %133, %137 : vector<2x32xf32>
    %139 = arith.mulf %132, %135 : vector<2x32xf32>
    %140 = arith.addf %138, %139 : vector<2x32xf32>
    %141 = math.tanh %140 : vector<2x32xf32>
    %142 = arith.mulf %134, %141 : vector<2x32xf32>
    %c1_82 = arith.constant 1 : index
    %c0_83 = arith.constant 0 : index
    %c0_84 = arith.constant 0 : index
    %143 = vector.load %arg8[%c1_82, %c0_83, %c0_84] : memref<2x2x32xf32, #tpu.memory_space<vmem>>, vector<1x2x32xf32>
    %144 = vector.shape_cast %143 : vector<1x2x32xf32> to vector<2x32xf32>
    %145 = vector.shape_cast %140 : vector<2x32xf32> to vector<1x2x32xf32>
    tpu.vector_store %arg8[%c1_82, %c0_83, %c0_84], %145 {strides = array<i32>} : memref<2x2x32xf32, #tpu.memory_space<vmem>>, vector<1x2x32xf32>,
    %c1_85 = arith.constant 1 : index
    %c0_86 = arith.constant 0 : index
    %c32_87 = arith.constant 32 : index
    %146 = vector.load %arg7[%c1_85, %c0_86, %c32_87] : memref<2x2x64xf32, #tpu.memory_space<vmem>>, vector<1x2x32xf32>
    %147 = vector.shape_cast %146 : vector<1x2x32xf32> to vector<2x32xf32>
    %148 = vector.shape_cast %142 : vector<2x32xf32> to vector<1x2x32xf32>
    tpu.vector_store %arg7[%c1_85, %c0_86, %c32_87], %148 {strides = array<i32>} : memref<2x2x64xf32, #tpu.memory_space<vmem>>, vector<1x2x32xf32>,
    %c2_i32 = arith.constant 2 : i32
    %149 = arith.index_cast %c2_i32 : i32 to index
    %c0_88 = arith.constant 0 : index
    %c0_89 = arith.constant 0 : index
    %150 = vector.load %arg1[%149, %c0_88, %c0_89] : memref<8x2x4xf32, #tpu.memory_space<vmem>>, vector<1x2x4xf32>
    %151 = vector.shape_cast %150 : vector<1x2x4xf32> to vector<2x4xf32>
    %c0_90 = arith.constant 0 : index
    %c0_91 = arith.constant 0 : index
    %c0_92 = arith.constant 0 : index
    %152 = vector.load %arg7[%c0_90, %c0_91, %c0_92] : memref<2x2x64xf32, #tpu.memory_space<vmem>>, vector<1x2x4xf32>
    %153 = vector.shape_cast %152 : vector<1x2x4xf32> to vector<2x4xf32>
    %154 = vector.shape_cast %151 : vector<2x4xf32> to vector<1x2x4xf32>
    tpu.vector_store %arg7[%c0_90, %c0_91, %c0_92], %154 {strides = array<i32>} : memref<2x2x64xf32, #tpu.memory_space<vmem>>, vector<1x2x4xf32>,
    %c0_93 = arith.constant 0 : index
    %c0_94 = arith.constant 0 : index
    %c0_95 = arith.constant 0 : index
    %155 = vector.load %arg7[%c0_93, %c0_94, %c0_95] : memref<2x2x64xf32, #tpu.memory_space<vmem>>, vector<1x2x64xf32>
    %156 = vector.shape_cast %155 : vector<1x2x64xf32> to vector<2x64xf32>
    %157 = arith.truncf %156 : vector<2x64xf32> to vector<2x64xbf16>
    %c0_96 = arith.constant 0 : index
    %c0_97 = arith.constant 0 : index
    %c0_98 = arith.constant 0 : index
    %158 = vector.load %arg2[%c0_96, %c0_97, %c0_98] : memref<2x64x128xbf16, #tpu.memory_space<vmem>>, vector<1x64x128xbf16>
    %159 = vector.shape_cast %158 : vector<1x64x128xbf16> to vector<64x128xbf16>
    %cst_99 = arith.constant dense<0.000000e+00> : vector<2x128xf32>
    %160 = tpu.matmul %157, %159, %cst_99 {dimension_numbers = #tpu.dot_dimension_numbers<[1], [0], [0], [1], [0, 0, 1, 1], [], []>} : vector<2x64xbf16>, vector<64x128xbf16>, vector<2x128xf32> -> vector<2x128xf32>
    %161 = arith.addf %160, %6 : vector<2x128xf32>
    %162 = arith.negf %161 : vector<2x128xf32>
    %163 = math.exp %162 : vector<2x128xf32>
    %cst_100 = arith.constant 1.000000e+00 : f32
    %164 = vector.broadcast %cst_100 : f32 to vector<2x128xf32>
    %165 = arith.addf %164, %163 : vector<2x128xf32>
    %166 = arith.divf %164, %165 : vector<2x128xf32>
    %167 = math.tanh %161 : vector<2x128xf32>
    %168 = vector.extract_strided_slice %166 {offsets = [0, 0], sizes = [2, 32], strides = [1, 1]} : vector<2x128xf32> to vector<2x32xf32>
    %169 = vector.extract_strided_slice %166 {offsets = [0, 32], sizes = [2, 32], strides = [1, 1]} : vector<2x128xf32> to vector<2x32xf32>
    %170 = vector.extract_strided_slice %166 {offsets = [0, 96], sizes = [2, 32], strides = [1, 1]} : vector<2x128xf32> to vector<2x32xf32>
    %171 = vector.extract_strided_slice %167 {offsets = [0, 64], sizes = [2, 32], strides = [1, 1]} : vector<2x128xf32> to vector<2x32xf32>
    %c0_101 = arith.constant 0 : index
    %c0_102 = arith.constant 0 : index
    %c0_103 = arith.constant 0 : index
    %172 = vector.load %arg8[%c0_101, %c0_102, %c0_103] : memref<2x2x32xf32, #tpu.memory_space<vmem>>, vector<1x2x32xf32>
    %173 = vector.shape_cast %172 : vector<1x2x32xf32> to vector<2x32xf32>
    %174 = arith.mulf %169, %173 : vector<2x32xf32>
    %175 = arith.mulf %168, %171 : vector<2x32xf32>
    %176 = arith.addf %174, %175 : vector<2x32xf32>
    %177 = math.tanh %176 : vector<2x32xf32>
    %178 = arith.mulf %170, %177 : vector<2x32xf32>
    %c0_104 = arith.constant 0 : index
    %c0_105 = arith.constant 0 : index
    %c0_106 = arith.constant 0 : index
    %179 = vector.load %arg8[%c0_104, %c0_105, %c0_106] : memref<2x2x32xf32, #tpu.memory_space<vmem>>, vector<1x2x32xf32>
    %180 = vector.shape_cast %179 : vector<1x2x32xf32> to vector<2x32xf32>
    %181 = vector.shape_cast %176 : vector<2x32xf32> to vector<1x2x32xf32>
    tpu.vector_store %arg8[%c0_104, %c0_105, %c0_106], %181 {strides = array<i32>} : memref<2x2x32xf32, #tpu.memory_space<vmem>>, vector<1x2x32xf32>,
    %c0_107 = arith.constant 0 : index
    %c0_108 = arith.constant 0 : index
    %c32_109 = arith.constant 32 : index
    %182 = vector.load %arg7[%c0_107, %c0_108, %c32_109] : memref<2x2x64xf32, #tpu.memory_space<vmem>>, vector<1x2x32xf32>
    %183 = vector.shape_cast %182 : vector<1x2x32xf32> to vector<2x32xf32>
    %184 = vector.shape_cast %178 : vector<2x32xf32> to vector<1x2x32xf32>
    tpu.vector_store %arg7[%c0_107, %c0_108, %c32_109], %184 {strides = array<i32>} : memref<2x2x64xf32, #tpu.memory_space<vmem>>, vector<1x2x32xf32>,
    %c1_110 = arith.constant 1 : index
    %c0_111 = arith.constant 0 : index
    %c0_112 = arith.constant 0 : index
    %185 = vector.load %arg7[%c1_110, %c0_111, %c0_112] : memref<2x2x64xf32, #tpu.memory_space<vmem>>, vector<1x2x32xf32>
    %186 = vector.shape_cast %185 : vector<1x2x32xf32> to vector<2x32xf32>
    %187 = vector.shape_cast %178 : vector<2x32xf32> to vector<1x2x32xf32>
    tpu.vector_store %arg7[%c1_110, %c0_111, %c0_112], %187 {strides = array<i32>} : memref<2x2x64xf32, #tpu.memory_space<vmem>>, vector<1x2x32xf32>,
    %c1_113 = arith.constant 1 : index
    %c0_114 = arith.constant 0 : index
    %c0_115 = arith.constant 0 : index
    %188 = vector.load %arg7[%c1_113, %c0_114, %c0_115] : memref<2x2x64xf32, #tpu.memory_space<vmem>>, vector<1x2x64xf32>
    %189 = vector.shape_cast %188 : vector<1x2x64xf32> to vector<2x64xf32>
    %190 = arith.truncf %189 : vector<2x64xf32> to vector<2x64xbf16>
    %c1_116 = arith.constant 1 : index
    %c0_117 = arith.constant 0 : index
    %c0_118 = arith.constant 0 : index
    %191 = vector.load %arg2[%c1_116, %c0_117, %c0_118] : memref<2x64x128xbf16, #tpu.memory_space<vmem>>, vector<1x64x128xbf16>
    %192 = vector.shape_cast %191 : vector<1x64x128xbf16> to vector<64x128xbf16>
    %cst_119 = arith.constant dense<0.000000e+00> : vector<2x128xf32>
    %193 = tpu.matmul %190, %192, %cst_119 {dimension_numbers = #tpu.dot_dimension_numbers<[1], [0], [0], [1], [0, 0, 1, 1], [], []>} : vector<2x64xbf16>, vector<64x128xbf16>, vector<2x128xf32> -> vector<2x128xf32>
    %194 = arith.addf %193, %10 : vector<2x128xf32>
    %195 = arith.negf %194 : vector<2x128xf32>
    %196 = math.exp %195 : vector<2x128xf32>
    %cst_120 = arith.constant 1.000000e+00 : f32
    %197 = vector.broadcast %cst_120 : f32 to vector<2x128xf32>
    %198 = arith.addf %197, %196 : vector<2x128xf32>
    %199 = arith.divf %197, %198 : vector<2x128xf32>
    %200 = math.tanh %194 : vector<2x128xf32>
    %201 = vector.extract_strided_slice %199 {offsets = [0, 0], sizes = [2, 32], strides = [1, 1]} : vector<2x128xf32> to vector<2x32xf32>
    %202 = vector.extract_strided_slice %199 {offsets = [0, 32], sizes = [2, 32], strides = [1, 1]} : vector<2x128xf32> to vector<2x32xf32>
    %203 = vector.extract_strided_slice %199 {offsets = [0, 96], sizes = [2, 32], strides = [1, 1]} : vector<2x128xf32> to vector<2x32xf32>
    %204 = vector.extract_strided_slice %200 {offsets = [0, 64], sizes = [2, 32], strides = [1, 1]} : vector<2x128xf32> to vector<2x32xf32>
    %c1_121 = arith.constant 1 : index
    %c0_122 = arith.constant 0 : index
    %c0_123 = arith.constant 0 : index
    %205 = vector.load %arg8[%c1_121, %c0_122, %c0_123] : memref<2x2x32xf32, #tpu.memory_space<vmem>>, vector<1x2x32xf32>
    %206 = vector.shape_cast %205 : vector<1x2x32xf32> to vector<2x32xf32>
    %207 = arith.mulf %202, %206 : vector<2x32xf32>
    %208 = arith.mulf %201, %204 : vector<2x32xf32>
    %209 = arith.addf %207, %208 : vector<2x32xf32>
    %210 = math.tanh %209 : vector<2x32xf32>
    %211 = arith.mulf %203, %210 : vector<2x32xf32>
    %c1_124 = arith.constant 1 : index
    %c0_125 = arith.constant 0 : index
    %c0_126 = arith.constant 0 : index
    %212 = vector.load %arg8[%c1_124, %c0_125, %c0_126] : memref<2x2x32xf32, #tpu.memory_space<vmem>>, vector<1x2x32xf32>
    %213 = vector.shape_cast %212 : vector<1x2x32xf32> to vector<2x32xf32>
    %214 = vector.shape_cast %209 : vector<2x32xf32> to vector<1x2x32xf32>
    tpu.vector_store %arg8[%c1_124, %c0_125, %c0_126], %214 {strides = array<i32>} : memref<2x2x32xf32, #tpu.memory_space<vmem>>, vector<1x2x32xf32>,
    %c1_127 = arith.constant 1 : index
    %c0_128 = arith.constant 0 : index
    %c32_129 = arith.constant 32 : index
    %215 = vector.load %arg7[%c1_127, %c0_128, %c32_129] : memref<2x2x64xf32, #tpu.memory_space<vmem>>, vector<1x2x32xf32>
    %216 = vector.shape_cast %215 : vector<1x2x32xf32> to vector<2x32xf32>
    %217 = vector.shape_cast %211 : vector<2x32xf32> to vector<1x2x32xf32>
    tpu.vector_store %arg7[%c1_127, %c0_128, %c32_129], %217 {strides = array<i32>} : memref<2x2x64xf32, #tpu.memory_space<vmem>>, vector<1x2x32xf32>,
    %c3_i32 = arith.constant 3 : i32
    %218 = arith.index_cast %c3_i32 : i32 to index
    %c0_130 = arith.constant 0 : index
    %c0_131 = arith.constant 0 : index
    %219 = vector.load %arg1[%218, %c0_130, %c0_131] : memref<8x2x4xf32, #tpu.memory_space<vmem>>, vector<1x2x4xf32>
    %220 = vector.shape_cast %219 : vector<1x2x4xf32> to vector<2x4xf32>
    %c0_132 = arith.constant 0 : index
    %c0_133 = arith.constant 0 : index
    %c0_134 = arith.constant 0 : index
    %221 = vector.load %arg7[%c0_132, %c0_133, %c0_134] : memref<2x2x64xf32, #tpu.memory_space<vmem>>, vector<1x2x4xf32>
    %222 = vector.shape_cast %221 : vector<1x2x4xf32> to vector<2x4xf32>
    %223 = vector.shape_cast %220 : vector<2x4xf32> to vector<1x2x4xf32>
    tpu.vector_store %arg7[%c0_132, %c0_133, %c0_134], %223 {strides = array<i32>} : memref<2x2x64xf32, #tpu.memory_space<vmem>>, vector<1x2x4xf32>,
    %c0_135 = arith.constant 0 : index
    %c0_136 = arith.constant 0 : index
    %c0_137 = arith.constant 0 : index
    %224 = vector.load %arg7[%c0_135, %c0_136, %c0_137] : memref<2x2x64xf32, #tpu.memory_space<vmem>>, vector<1x2x64xf32>
    %225 = vector.shape_cast %224 : vector<1x2x64xf32> to vector<2x64xf32>
    %226 = arith.truncf %225 : vector<2x64xf32> to vector<2x64xbf16>
    %c0_138 = arith.constant 0 : index
    %c0_139 = arith.constant 0 : index
    %c0_140 = arith.constant 0 : index
    %227 = vector.load %arg2[%c0_138, %c0_139, %c0_140] : memref<2x64x128xbf16, #tpu.memory_space<vmem>>, vector<1x64x128xbf16>
    %228 = vector.shape_cast %227 : vector<1x64x128xbf16> to vector<64x128xbf16>
    %cst_141 = arith.constant dense<0.000000e+00> : vector<2x128xf32>
    %229 = tpu.matmul %226, %228, %cst_141 {dimension_numbers = #tpu.dot_dimension_numbers<[1], [0], [0], [1], [0, 0, 1, 1], [], []>} : vector<2x64xbf16>, vector<64x128xbf16>, vector<2x128xf32> -> vector<2x128xf32>
    %230 = arith.addf %229, %6 : vector<2x128xf32>
    %231 = arith.negf %230 : vector<2x128xf32>
    %232 = math.exp %231 : vector<2x128xf32>
    %cst_142 = arith.constant 1.000000e+00 : f32
    %233 = vector.broadcast %cst_142 : f32 to vector<2x128xf32>
    %234 = arith.addf %233, %232 : vector<2x128xf32>
    %235 = arith.divf %233, %234 : vector<2x128xf32>
    %236 = math.tanh %230 : vector<2x128xf32>
    %237 = vector.extract_strided_slice %235 {offsets = [0, 0], sizes = [2, 32], strides = [1, 1]} : vector<2x128xf32> to vector<2x32xf32>
    %238 = vector.extract_strided_slice %235 {offsets = [0, 32], sizes = [2, 32], strides = [1, 1]} : vector<2x128xf32> to vector<2x32xf32>
    %239 = vector.extract_strided_slice %235 {offsets = [0, 96], sizes = [2, 32], strides = [1, 1]} : vector<2x128xf32> to vector<2x32xf32>
    %240 = vector.extract_strided_slice %236 {offsets = [0, 64], sizes = [2, 32], strides = [1, 1]} : vector<2x128xf32> to vector<2x32xf32>
    %c0_143 = arith.constant 0 : index
    %c0_144 = arith.constant 0 : index
    %c0_145 = arith.constant 0 : index
    %241 = vector.load %arg8[%c0_143, %c0_144, %c0_145] : memref<2x2x32xf32, #tpu.memory_space<vmem>>, vector<1x2x32xf32>
    %242 = vector.shape_cast %241 : vector<1x2x32xf32> to vector<2x32xf32>
    %243 = arith.mulf %238, %242 : vector<2x32xf32>
    %244 = arith.mulf %237, %240 : vector<2x32xf32>
    %245 = arith.addf %243, %244 : vector<2x32xf32>
    %246 = math.tanh %245 : vector<2x32xf32>
    %247 = arith.mulf %239, %246 : vector<2x32xf32>
    %c0_146 = arith.constant 0 : index
    %c0_147 = arith.constant 0 : index
    %c0_148 = arith.constant 0 : index
    %248 = vector.load %arg8[%c0_146, %c0_147, %c0_148] : memref<2x2x32xf32, #tpu.memory_space<vmem>>, vector<1x2x32xf32>
    %249 = vector.shape_cast %248 : vector<1x2x32xf32> to vector<2x32xf32>
    %250 = vector.shape_cast %245 : vector<2x32xf32> to vector<1x2x32xf32>
    tpu.vector_store %arg8[%c0_146, %c0_147, %c0_148], %250 {strides = array<i32>} : memref<2x2x32xf32, #tpu.memory_space<vmem>>, vector<1x2x32xf32>,
    %c0_149 = arith.constant 0 : index
    %c0_150 = arith.constant 0 : index
    %c32_151 = arith.constant 32 : index
    %251 = vector.load %arg7[%c0_149, %c0_150, %c32_151] : memref<2x2x64xf32, #tpu.memory_space<vmem>>, vector<1x2x32xf32>
    %252 = vector.shape_cast %251 : vector<1x2x32xf32> to vector<2x32xf32>
    %253 = vector.shape_cast %247 : vector<2x32xf32> to vector<1x2x32xf32>
    tpu.vector_store %arg7[%c0_149, %c0_150, %c32_151], %253 {strides = array<i32>} : memref<2x2x64xf32, #tpu.memory_space<vmem>>, vector<1x2x32xf32>,
    %c1_152 = arith.constant 1 : index
    %c0_153 = arith.constant 0 : index
    %c0_154 = arith.constant 0 : index
    %254 = vector.load %arg7[%c1_152, %c0_153, %c0_154] : memref<2x2x64xf32, #tpu.memory_space<vmem>>, vector<1x2x32xf32>
    %255 = vector.shape_cast %254 : vector<1x2x32xf32> to vector<2x32xf32>
    %256 = vector.shape_cast %247 : vector<2x32xf32> to vector<1x2x32xf32>
    tpu.vector_store %arg7[%c1_152, %c0_153, %c0_154], %256 {strides = array<i32>} : memref<2x2x64xf32, #tpu.memory_space<vmem>>, vector<1x2x32xf32>,
    %c1_155 = arith.constant 1 : index
    %c0_156 = arith.constant 0 : index
    %c0_157 = arith.constant 0 : index
    %257 = vector.load %arg7[%c1_155, %c0_156, %c0_157] : memref<2x2x64xf32, #tpu.memory_space<vmem>>, vector<1x2x64xf32>
    %258 = vector.shape_cast %257 : vector<1x2x64xf32> to vector<2x64xf32>
    %259 = arith.truncf %258 : vector<2x64xf32> to vector<2x64xbf16>
    %c1_158 = arith.constant 1 : index
    %c0_159 = arith.constant 0 : index
    %c0_160 = arith.constant 0 : index
    %260 = vector.load %arg2[%c1_158, %c0_159, %c0_160] : memref<2x64x128xbf16, #tpu.memory_space<vmem>>, vector<1x64x128xbf16>
    %261 = vector.shape_cast %260 : vector<1x64x128xbf16> to vector<64x128xbf16>
    %cst_161 = arith.constant dense<0.000000e+00> : vector<2x128xf32>
    %262 = tpu.matmul %259, %261, %cst_161 {dimension_numbers = #tpu.dot_dimension_numbers<[1], [0], [0], [1], [0, 0, 1, 1], [], []>} : vector<2x64xbf16>, vector<64x128xbf16>, vector<2x128xf32> -> vector<2x128xf32>
    %263 = arith.addf %262, %10 : vector<2x128xf32>
    %264 = arith.negf %263 : vector<2x128xf32>
    %265 = math.exp %264 : vector<2x128xf32>
    %cst_162 = arith.constant 1.000000e+00 : f32
    %266 = vector.broadcast %cst_162 : f32 to vector<2x128xf32>
    %267 = arith.addf %266, %265 : vector<2x128xf32>
    %268 = arith.divf %266, %267 : vector<2x128xf32>
    %269 = math.tanh %263 : vector<2x128xf32>
    %270 = vector.extract_strided_slice %268 {offsets = [0, 0], sizes = [2, 32], strides = [1, 1]} : vector<2x128xf32> to vector<2x32xf32>
    %271 = vector.extract_strided_slice %268 {offsets = [0, 32], sizes = [2, 32], strides = [1, 1]} : vector<2x128xf32> to vector<2x32xf32>
    %272 = vector.extract_strided_slice %268 {offsets = [0, 96], sizes = [2, 32], strides = [1, 1]} : vector<2x128xf32> to vector<2x32xf32>
    %273 = vector.extract_strided_slice %269 {offsets = [0, 64], sizes = [2, 32], strides = [1, 1]} : vector<2x128xf32> to vector<2x32xf32>
    %c1_163 = arith.constant 1 : index
    %c0_164 = arith.constant 0 : index
    %c0_165 = arith.constant 0 : index
    %274 = vector.load %arg8[%c1_163, %c0_164, %c0_165] : memref<2x2x32xf32, #tpu.memory_space<vmem>>, vector<1x2x32xf32>
    %275 = vector.shape_cast %274 : vector<1x2x32xf32> to vector<2x32xf32>
    %276 = arith.mulf %271, %275 : vector<2x32xf32>
    %277 = arith.mulf %270, %273 : vector<2x32xf32>
    %278 = arith.addf %276, %277 : vector<2x32xf32>
    %279 = math.tanh %278 : vector<2x32xf32>
    %280 = arith.mulf %272, %279 : vector<2x32xf32>
    %c1_166 = arith.constant 1 : index
    %c0_167 = arith.constant 0 : index
    %c0_168 = arith.constant 0 : index
    %281 = vector.load %arg8[%c1_166, %c0_167, %c0_168] : memref<2x2x32xf32, #tpu.memory_space<vmem>>, vector<1x2x32xf32>
    %282 = vector.shape_cast %281 : vector<1x2x32xf32> to vector<2x32xf32>
    %283 = vector.shape_cast %278 : vector<2x32xf32> to vector<1x2x32xf32>
    tpu.vector_store %arg8[%c1_166, %c0_167, %c0_168], %283 {strides = array<i32>} : memref<2x2x32xf32, #tpu.memory_space<vmem>>, vector<1x2x32xf32>,
    %c1_169 = arith.constant 1 : index
    %c0_170 = arith.constant 0 : index
    %c32_171 = arith.constant 32 : index
    %284 = vector.load %arg7[%c1_169, %c0_170, %c32_171] : memref<2x2x64xf32, #tpu.memory_space<vmem>>, vector<1x2x32xf32>
    %285 = vector.shape_cast %284 : vector<1x2x32xf32> to vector<2x32xf32>
    %286 = vector.shape_cast %280 : vector<2x32xf32> to vector<1x2x32xf32>
    tpu.vector_store %arg7[%c1_169, %c0_170, %c32_171], %286 {strides = array<i32>} : memref<2x2x64xf32, #tpu.memory_space<vmem>>, vector<1x2x32xf32>,
    %c4_i32 = arith.constant 4 : i32
    %287 = arith.index_cast %c4_i32 : i32 to index
    %c0_172 = arith.constant 0 : index
    %c0_173 = arith.constant 0 : index
    %288 = vector.load %arg1[%287, %c0_172, %c0_173] : memref<8x2x4xf32, #tpu.memory_space<vmem>>, vector<1x2x4xf32>
    %289 = vector.shape_cast %288 : vector<1x2x4xf32> to vector<2x4xf32>
    %c0_174 = arith.constant 0 : index
    %c0_175 = arith.constant 0 : index
    %c0_176 = arith.constant 0 : index
    %290 = vector.load %arg7[%c0_174, %c0_175, %c0_176] : memref<2x2x64xf32, #tpu.memory_space<vmem>>, vector<1x2x4xf32>
    %291 = vector.shape_cast %290 : vector<1x2x4xf32> to vector<2x4xf32>
    %292 = vector.shape_cast %289 : vector<2x4xf32> to vector<1x2x4xf32>
    tpu.vector_store %arg7[%c0_174, %c0_175, %c0_176], %292 {strides = array<i32>} : memref<2x2x64xf32, #tpu.memory_space<vmem>>, vector<1x2x4xf32>,
    %c0_177 = arith.constant 0 : index
    %c0_178 = arith.constant 0 : index
    %c0_179 = arith.constant 0 : index
    %293 = vector.load %arg7[%c0_177, %c0_178, %c0_179] : memref<2x2x64xf32, #tpu.memory_space<vmem>>, vector<1x2x64xf32>
    %294 = vector.shape_cast %293 : vector<1x2x64xf32> to vector<2x64xf32>
    %295 = arith.truncf %294 : vector<2x64xf32> to vector<2x64xbf16>
    %c0_180 = arith.constant 0 : index
    %c0_181 = arith.constant 0 : index
    %c0_182 = arith.constant 0 : index
    %296 = vector.load %arg2[%c0_180, %c0_181, %c0_182] : memref<2x64x128xbf16, #tpu.memory_space<vmem>>, vector<1x64x128xbf16>
    %297 = vector.shape_cast %296 : vector<1x64x128xbf16> to vector<64x128xbf16>
    %cst_183 = arith.constant dense<0.000000e+00> : vector<2x128xf32>
    %298 = tpu.matmul %295, %297, %cst_183 {dimension_numbers = #tpu.dot_dimension_numbers<[1], [0], [0], [1], [0, 0, 1, 1], [], []>} : vector<2x64xbf16>, vector<64x128xbf16>, vector<2x128xf32> -> vector<2x128xf32>
    %299 = arith.addf %298, %6 : vector<2x128xf32>
    %300 = arith.negf %299 : vector<2x128xf32>
    %301 = math.exp %300 : vector<2x128xf32>
    %cst_184 = arith.constant 1.000000e+00 : f32
    %302 = vector.broadcast %cst_184 : f32 to vector<2x128xf32>
    %303 = arith.addf %302, %301 : vector<2x128xf32>
    %304 = arith.divf %302, %303 : vector<2x128xf32>
    %305 = math.tanh %299 : vector<2x128xf32>
    %306 = vector.extract_strided_slice %304 {offsets = [0, 0], sizes = [2, 32], strides = [1, 1]} : vector<2x128xf32> to vector<2x32xf32>
    %307 = vector.extract_strided_slice %304 {offsets = [0, 32], sizes = [2, 32], strides = [1, 1]} : vector<2x128xf32> to vector<2x32xf32>
    %308 = vector.extract_strided_slice %304 {offsets = [0, 96], sizes = [2, 32], strides = [1, 1]} : vector<2x128xf32> to vector<2x32xf32>
    %309 = vector.extract_strided_slice %305 {offsets = [0, 64], sizes = [2, 32], strides = [1, 1]} : vector<2x128xf32> to vector<2x32xf32>
    %c0_185 = arith.constant 0 : index
    %c0_186 = arith.constant 0 : index
    %c0_187 = arith.constant 0 : index
    %310 = vector.load %arg8[%c0_185, %c0_186, %c0_187] : memref<2x2x32xf32, #tpu.memory_space<vmem>>, vector<1x2x32xf32>
    %311 = vector.shape_cast %310 : vector<1x2x32xf32> to vector<2x32xf32>
    %312 = arith.mulf %307, %311 : vector<2x32xf32>
    %313 = arith.mulf %306, %309 : vector<2x32xf32>
    %314 = arith.addf %312, %313 : vector<2x32xf32>
    %315 = math.tanh %314 : vector<2x32xf32>
    %316 = arith.mulf %308, %315 : vector<2x32xf32>
    %c0_188 = arith.constant 0 : index
    %c0_189 = arith.constant 0 : index
    %c0_190 = arith.constant 0 : index
    %317 = vector.load %arg8[%c0_188, %c0_189, %c0_190] : memref<2x2x32xf32, #tpu.memory_space<vmem>>, vector<1x2x32xf32>
    %318 = vector.shape_cast %317 : vector<1x2x32xf32> to vector<2x32xf32>
    %319 = vector.shape_cast %314 : vector<2x32xf32> to vector<1x2x32xf32>
    tpu.vector_store %arg8[%c0_188, %c0_189, %c0_190], %319 {strides = array<i32>} : memref<2x2x32xf32, #tpu.memory_space<vmem>>, vector<1x2x32xf32>,
    %c0_191 = arith.constant 0 : index
    %c0_192 = arith.constant 0 : index
    %c32_193 = arith.constant 32 : index
    %320 = vector.load %arg7[%c0_191, %c0_192, %c32_193] : memref<2x2x64xf32, #tpu.memory_space<vmem>>, vector<1x2x32xf32>
    %321 = vector.shape_cast %320 : vector<1x2x32xf32> to vector<2x32xf32>
    %322 = vector.shape_cast %316 : vector<2x32xf32> to vector<1x2x32xf32>
    tpu.vector_store %arg7[%c0_191, %c0_192, %c32_193], %322 {strides = array<i32>} : memref<2x2x64xf32, #tpu.memory_space<vmem>>, vector<1x2x32xf32>,
    %c1_194 = arith.constant 1 : index
    %c0_195 = arith.constant 0 : index
    %c0_196 = arith.constant 0 : index
    %323 = vector.load %arg7[%c1_194, %c0_195, %c0_196] : memref<2x2x64xf32, #tpu.memory_space<vmem>>, vector<1x2x32xf32>
    %324 = vector.shape_cast %323 : vector<1x2x32xf32> to vector<2x32xf32>
    %325 = vector.shape_cast %316 : vector<2x32xf32> to vector<1x2x32xf32>
    tpu.vector_store %arg7[%c1_194, %c0_195, %c0_196], %325 {strides = array<i32>} : memref<2x2x64xf32, #tpu.memory_space<vmem>>, vector<1x2x32xf32>,
    %c1_197 = arith.constant 1 : index
    %c0_198 = arith.constant 0 : index
    %c0_199 = arith.constant 0 : index
    %326 = vector.load %arg7[%c1_197, %c0_198, %c0_199] : memref<2x2x64xf32, #tpu.memory_space<vmem>>, vector<1x2x64xf32>
    %327 = vector.shape_cast %326 : vector<1x2x64xf32> to vector<2x64xf32>
    %328 = arith.truncf %327 : vector<2x64xf32> to vector<2x64xbf16>
    %c1_200 = arith.constant 1 : index
    %c0_201 = arith.constant 0 : index
    %c0_202 = arith.constant 0 : index
    %329 = vector.load %arg2[%c1_200, %c0_201, %c0_202] : memref<2x64x128xbf16, #tpu.memory_space<vmem>>, vector<1x64x128xbf16>
    %330 = vector.shape_cast %329 : vector<1x64x128xbf16> to vector<64x128xbf16>
    %cst_203 = arith.constant dense<0.000000e+00> : vector<2x128xf32>
    %331 = tpu.matmul %328, %330, %cst_203 {dimension_numbers = #tpu.dot_dimension_numbers<[1], [0], [0], [1], [0, 0, 1, 1], [], []>} : vector<2x64xbf16>, vector<64x128xbf16>, vector<2x128xf32> -> vector<2x128xf32>
    %332 = arith.addf %331, %10 : vector<2x128xf32>
    %333 = arith.negf %332 : vector<2x128xf32>
    %334 = math.exp %333 : vector<2x128xf32>
    %cst_204 = arith.constant 1.000000e+00 : f32
    %335 = vector.broadcast %cst_204 : f32 to vector<2x128xf32>
    %336 = arith.addf %335, %334 : vector<2x128xf32>
    %337 = arith.divf %335, %336 : vector<2x128xf32>
    %338 = math.tanh %332 : vector<2x128xf32>
    %339 = vector.extract_strided_slice %337 {offsets = [0, 0], sizes = [2, 32], strides = [1, 1]} : vector<2x128xf32> to vector<2x32xf32>
    %340 = vector.extract_strided_slice %337 {offsets = [0, 32], sizes = [2, 32], strides = [1, 1]} : vector<2x128xf32> to vector<2x32xf32>
    %341 = vector.extract_strided_slice %337 {offsets = [0, 96], sizes = [2, 32], strides = [1, 1]} : vector<2x128xf32> to vector<2x32xf32>
    %342 = vector.extract_strided_slice %338 {offsets = [0, 64], sizes = [2, 32], strides = [1, 1]} : vector<2x128xf32> to vector<2x32xf32>
    %c1_205 = arith.constant 1 : index
    %c0_206 = arith.constant 0 : index
    %c0_207 = arith.constant 0 : index
    %343 = vector.load %arg8[%c1_205, %c0_206, %c0_207] : memref<2x2x32xf32, #tpu.memory_space<vmem>>, vector<1x2x32xf32>
    %344 = vector.shape_cast %343 : vector<1x2x32xf32> to vector<2x32xf32>
    %345 = arith.mulf %340, %344 : vector<2x32xf32>
    %346 = arith.mulf %339, %342 : vector<2x32xf32>
    %347 = arith.addf %345, %346 : vector<2x32xf32>
    %348 = math.tanh %347 : vector<2x32xf32>
    %349 = arith.mulf %341, %348 : vector<2x32xf32>
    %c1_208 = arith.constant 1 : index
    %c0_209 = arith.constant 0 : index
    %c0_210 = arith.constant 0 : index
    %350 = vector.load %arg8[%c1_208, %c0_209, %c0_210] : memref<2x2x32xf32, #tpu.memory_space<vmem>>, vector<1x2x32xf32>
    %351 = vector.shape_cast %350 : vector<1x2x32xf32> to vector<2x32xf32>
    %352 = vector.shape_cast %347 : vector<2x32xf32> to vector<1x2x32xf32>
    tpu.vector_store %arg8[%c1_208, %c0_209, %c0_210], %352 {strides = array<i32>} : memref<2x2x32xf32, #tpu.memory_space<vmem>>, vector<1x2x32xf32>,
    %c1_211 = arith.constant 1 : index
    %c0_212 = arith.constant 0 : index
    %c32_213 = arith.constant 32 : index
    %353 = vector.load %arg7[%c1_211, %c0_212, %c32_213] : memref<2x2x64xf32, #tpu.memory_space<vmem>>, vector<1x2x32xf32>
    %354 = vector.shape_cast %353 : vector<1x2x32xf32> to vector<2x32xf32>
    %355 = vector.shape_cast %349 : vector<2x32xf32> to vector<1x2x32xf32>
    tpu.vector_store %arg7[%c1_211, %c0_212, %c32_213], %355 {strides = array<i32>} : memref<2x2x64xf32, #tpu.memory_space<vmem>>, vector<1x2x32xf32>,
    %c5_i32 = arith.constant 5 : i32
    %356 = arith.index_cast %c5_i32 : i32 to index
    %c0_214 = arith.constant 0 : index
    %c0_215 = arith.constant 0 : index
    %357 = vector.load %arg1[%356, %c0_214, %c0_215] : memref<8x2x4xf32, #tpu.memory_space<vmem>>, vector<1x2x4xf32>
    %358 = vector.shape_cast %357 : vector<1x2x4xf32> to vector<2x4xf32>
    %c0_216 = arith.constant 0 : index
    %c0_217 = arith.constant 0 : index
    %c0_218 = arith.constant 0 : index
    %359 = vector.load %arg7[%c0_216, %c0_217, %c0_218] : memref<2x2x64xf32, #tpu.memory_space<vmem>>, vector<1x2x4xf32>
    %360 = vector.shape_cast %359 : vector<1x2x4xf32> to vector<2x4xf32>
    %361 = vector.shape_cast %358 : vector<2x4xf32> to vector<1x2x4xf32>
    tpu.vector_store %arg7[%c0_216, %c0_217, %c0_218], %361 {strides = array<i32>} : memref<2x2x64xf32, #tpu.memory_space<vmem>>, vector<1x2x4xf32>,
    %c0_219 = arith.constant 0 : index
    %c0_220 = arith.constant 0 : index
    %c0_221 = arith.constant 0 : index
    %362 = vector.load %arg7[%c0_219, %c0_220, %c0_221] : memref<2x2x64xf32, #tpu.memory_space<vmem>>, vector<1x2x64xf32>
    %363 = vector.shape_cast %362 : vector<1x2x64xf32> to vector<2x64xf32>
    %364 = arith.truncf %363 : vector<2x64xf32> to vector<2x64xbf16>
    %c0_222 = arith.constant 0 : index
    %c0_223 = arith.constant 0 : index
    %c0_224 = arith.constant 0 : index
    %365 = vector.load %arg2[%c0_222, %c0_223, %c0_224] : memref<2x64x128xbf16, #tpu.memory_space<vmem>>, vector<1x64x128xbf16>
    %366 = vector.shape_cast %365 : vector<1x64x128xbf16> to vector<64x128xbf16>
    %cst_225 = arith.constant dense<0.000000e+00> : vector<2x128xf32>
    %367 = tpu.matmul %364, %366, %cst_225 {dimension_numbers = #tpu.dot_dimension_numbers<[1], [0], [0], [1], [0, 0, 1, 1], [], []>} : vector<2x64xbf16>, vector<64x128xbf16>, vector<2x128xf32> -> vector<2x128xf32>
    %368 = arith.addf %367, %6 : vector<2x128xf32>
    %369 = arith.negf %368 : vector<2x128xf32>
    %370 = math.exp %369 : vector<2x128xf32>
    %cst_226 = arith.constant 1.000000e+00 : f32
    %371 = vector.broadcast %cst_226 : f32 to vector<2x128xf32>
    %372 = arith.addf %371, %370 : vector<2x128xf32>
    %373 = arith.divf %371, %372 : vector<2x128xf32>
    %374 = math.tanh %368 : vector<2x128xf32>
    %375 = vector.extract_strided_slice %373 {offsets = [0, 0], sizes = [2, 32], strides = [1, 1]} : vector<2x128xf32> to vector<2x32xf32>
    %376 = vector.extract_strided_slice %373 {offsets = [0, 32], sizes = [2, 32], strides = [1, 1]} : vector<2x128xf32> to vector<2x32xf32>
    %377 = vector.extract_strided_slice %373 {offsets = [0, 96], sizes = [2, 32], strides = [1, 1]} : vector<2x128xf32> to vector<2x32xf32>
    %378 = vector.extract_strided_slice %374 {offsets = [0, 64], sizes = [2, 32], strides = [1, 1]} : vector<2x128xf32> to vector<2x32xf32>
    %c0_227 = arith.constant 0 : index
    %c0_228 = arith.constant 0 : index
    %c0_229 = arith.constant 0 : index
    %379 = vector.load %arg8[%c0_227, %c0_228, %c0_229] : memref<2x2x32xf32, #tpu.memory_space<vmem>>, vector<1x2x32xf32>
    %380 = vector.shape_cast %379 : vector<1x2x32xf32> to vector<2x32xf32>
    %381 = arith.mulf %376, %380 : vector<2x32xf32>
    %382 = arith.mulf %375, %378 : vector<2x32xf32>
    %383 = arith.addf %381, %382 : vector<2x32xf32>
    %384 = math.tanh %383 : vector<2x32xf32>
    %385 = arith.mulf %377, %384 : vector<2x32xf32>
    %c0_230 = arith.constant 0 : index
    %c0_231 = arith.constant 0 : index
    %c0_232 = arith.constant 0 : index
    %386 = vector.load %arg8[%c0_230, %c0_231, %c0_232] : memref<2x2x32xf32, #tpu.memory_space<vmem>>, vector<1x2x32xf32>
    %387 = vector.shape_cast %386 : vector<1x2x32xf32> to vector<2x32xf32>
    %388 = vector.shape_cast %383 : vector<2x32xf32> to vector<1x2x32xf32>
    tpu.vector_store %arg8[%c0_230, %c0_231, %c0_232], %388 {strides = array<i32>} : memref<2x2x32xf32, #tpu.memory_space<vmem>>, vector<1x2x32xf32>,
    %c0_233 = arith.constant 0 : index
    %c0_234 = arith.constant 0 : index
    %c32_235 = arith.constant 32 : index
    %389 = vector.load %arg7[%c0_233, %c0_234, %c32_235] : memref<2x2x64xf32, #tpu.memory_space<vmem>>, vector<1x2x32xf32>
    %390 = vector.shape_cast %389 : vector<1x2x32xf32> to vector<2x32xf32>
    %391 = vector.shape_cast %385 : vector<2x32xf32> to vector<1x2x32xf32>
    tpu.vector_store %arg7[%c0_233, %c0_234, %c32_235], %391 {strides = array<i32>} : memref<2x2x64xf32, #tpu.memory_space<vmem>>, vector<1x2x32xf32>,
    %c1_236 = arith.constant 1 : index
    %c0_237 = arith.constant 0 : index
    %c0_238 = arith.constant 0 : index
    %392 = vector.load %arg7[%c1_236, %c0_237, %c0_238] : memref<2x2x64xf32, #tpu.memory_space<vmem>>, vector<1x2x32xf32>
    %393 = vector.shape_cast %392 : vector<1x2x32xf32> to vector<2x32xf32>
    %394 = vector.shape_cast %385 : vector<2x32xf32> to vector<1x2x32xf32>
    tpu.vector_store %arg7[%c1_236, %c0_237, %c0_238], %394 {strides = array<i32>} : memref<2x2x64xf32, #tpu.memory_space<vmem>>, vector<1x2x32xf32>,
    %c1_239 = arith.constant 1 : index
    %c0_240 = arith.constant 0 : index
    %c0_241 = arith.constant 0 : index
    %395 = vector.load %arg7[%c1_239, %c0_240, %c0_241] : memref<2x2x64xf32, #tpu.memory_space<vmem>>, vector<1x2x64xf32>
    %396 = vector.shape_cast %395 : vector<1x2x64xf32> to vector<2x64xf32>
    %397 = arith.truncf %396 : vector<2x64xf32> to vector<2x64xbf16>
    %c1_242 = arith.constant 1 : index
    %c0_243 = arith.constant 0 : index
    %c0_244 = arith.constant 0 : index
    %398 = vector.load %arg2[%c1_242, %c0_243, %c0_244] : memref<2x64x128xbf16, #tpu.memory_space<vmem>>, vector<1x64x128xbf16>
    %399 = vector.shape_cast %398 : vector<1x64x128xbf16> to vector<64x128xbf16>
    %cst_245 = arith.constant dense<0.000000e+00> : vector<2x128xf32>
    %400 = tpu.matmul %397, %399, %cst_245 {dimension_numbers = #tpu.dot_dimension_numbers<[1], [0], [0], [1], [0, 0, 1, 1], [], []>} : vector<2x64xbf16>, vector<64x128xbf16>, vector<2x128xf32> -> vector<2x128xf32>
    %401 = arith.addf %400, %10 : vector<2x128xf32>
    %402 = arith.negf %401 : vector<2x128xf32>
    %403 = math.exp %402 : vector<2x128xf32>
    %cst_246 = arith.constant 1.000000e+00 : f32
    %404 = vector.broadcast %cst_246 : f32 to vector<2x128xf32>
    %405 = arith.addf %404, %403 : vector<2x128xf32>
    %406 = arith.divf %404, %405 : vector<2x128xf32>
    %407 = math.tanh %401 : vector<2x128xf32>
    %408 = vector.extract_strided_slice %406 {offsets = [0, 0], sizes = [2, 32], strides = [1, 1]} : vector<2x128xf32> to vector<2x32xf32>
    %409 = vector.extract_strided_slice %406 {offsets = [0, 32], sizes = [2, 32], strides = [1, 1]} : vector<2x128xf32> to vector<2x32xf32>
    %410 = vector.extract_strided_slice %406 {offsets = [0, 96], sizes = [2, 32], strides = [1, 1]} : vector<2x128xf32> to vector<2x32xf32>
    %411 = vector.extract_strided_slice %407 {offsets = [0, 64], sizes = [2, 32], strides = [1, 1]} : vector<2x128xf32> to vector<2x32xf32>
    %c1_247 = arith.constant 1 : index
    %c0_248 = arith.constant 0 : index
    %c0_249 = arith.constant 0 : index
    %412 = vector.load %arg8[%c1_247, %c0_248, %c0_249] : memref<2x2x32xf32, #tpu.memory_space<vmem>>, vector<1x2x32xf32>
    %413 = vector.shape_cast %412 : vector<1x2x32xf32> to vector<2x32xf32>
    %414 = arith.mulf %409, %413 : vector<2x32xf32>
    %415 = arith.mulf %408, %411 : vector<2x32xf32>
    %416 = arith.addf %414, %415 : vector<2x32xf32>
    %417 = math.tanh %416 : vector<2x32xf32>
    %418 = arith.mulf %410, %417 : vector<2x32xf32>
    %c1_250 = arith.constant 1 : index
    %c0_251 = arith.constant 0 : index
    %c0_252 = arith.constant 0 : index
    %419 = vector.load %arg8[%c1_250, %c0_251, %c0_252] : memref<2x2x32xf32, #tpu.memory_space<vmem>>, vector<1x2x32xf32>
    %420 = vector.shape_cast %419 : vector<1x2x32xf32> to vector<2x32xf32>
    %421 = vector.shape_cast %416 : vector<2x32xf32> to vector<1x2x32xf32>
    tpu.vector_store %arg8[%c1_250, %c0_251, %c0_252], %421 {strides = array<i32>} : memref<2x2x32xf32, #tpu.memory_space<vmem>>, vector<1x2x32xf32>,
    %c1_253 = arith.constant 1 : index
    %c0_254 = arith.constant 0 : index
    %c32_255 = arith.constant 32 : index
    %422 = vector.load %arg7[%c1_253, %c0_254, %c32_255] : memref<2x2x64xf32, #tpu.memory_space<vmem>>, vector<1x2x32xf32>
    %423 = vector.shape_cast %422 : vector<1x2x32xf32> to vector<2x32xf32>
    %424 = vector.shape_cast %418 : vector<2x32xf32> to vector<1x2x32xf32>
    tpu.vector_store %arg7[%c1_253, %c0_254, %c32_255], %424 {strides = array<i32>} : memref<2x2x64xf32, #tpu.memory_space<vmem>>, vector<1x2x32xf32>,
    %c6_i32 = arith.constant 6 : i32
    %425 = arith.index_cast %c6_i32 : i32 to index
    %c0_256 = arith.constant 0 : index
    %c0_257 = arith.constant 0 : index
    %426 = vector.load %arg1[%425, %c0_256, %c0_257] : memref<8x2x4xf32, #tpu.memory_space<vmem>>, vector<1x2x4xf32>
    %427 = vector.shape_cast %426 : vector<1x2x4xf32> to vector<2x4xf32>
    %c0_258 = arith.constant 0 : index
    %c0_259 = arith.constant 0 : index
    %c0_260 = arith.constant 0 : index
    %428 = vector.load %arg7[%c0_258, %c0_259, %c0_260] : memref<2x2x64xf32, #tpu.memory_space<vmem>>, vector<1x2x4xf32>
    %429 = vector.shape_cast %428 : vector<1x2x4xf32> to vector<2x4xf32>
    %430 = vector.shape_cast %427 : vector<2x4xf32> to vector<1x2x4xf32>
    tpu.vector_store %arg7[%c0_258, %c0_259, %c0_260], %430 {strides = array<i32>} : memref<2x2x64xf32, #tpu.memory_space<vmem>>, vector<1x2x4xf32>,
    %c0_261 = arith.constant 0 : index
    %c0_262 = arith.constant 0 : index
    %c0_263 = arith.constant 0 : index
    %431 = vector.load %arg7[%c0_261, %c0_262, %c0_263] : memref<2x2x64xf32, #tpu.memory_space<vmem>>, vector<1x2x64xf32>
    %432 = vector.shape_cast %431 : vector<1x2x64xf32> to vector<2x64xf32>
    %433 = arith.truncf %432 : vector<2x64xf32> to vector<2x64xbf16>
    %c0_264 = arith.constant 0 : index
    %c0_265 = arith.constant 0 : index
    %c0_266 = arith.constant 0 : index
    %434 = vector.load %arg2[%c0_264, %c0_265, %c0_266] : memref<2x64x128xbf16, #tpu.memory_space<vmem>>, vector<1x64x128xbf16>
    %435 = vector.shape_cast %434 : vector<1x64x128xbf16> to vector<64x128xbf16>
    %cst_267 = arith.constant dense<0.000000e+00> : vector<2x128xf32>
    %436 = tpu.matmul %433, %435, %cst_267 {dimension_numbers = #tpu.dot_dimension_numbers<[1], [0], [0], [1], [0, 0, 1, 1], [], []>} : vector<2x64xbf16>, vector<64x128xbf16>, vector<2x128xf32> -> vector<2x128xf32>
    %437 = arith.addf %436, %6 : vector<2x128xf32>
    %438 = arith.negf %437 : vector<2x128xf32>
    %439 = math.exp %438 : vector<2x128xf32>
    %cst_268 = arith.constant 1.000000e+00 : f32
    %440 = vector.broadcast %cst_268 : f32 to vector<2x128xf32>
    %441 = arith.addf %440, %439 : vector<2x128xf32>
    %442 = arith.divf %440, %441 : vector<2x128xf32>
    %443 = math.tanh %437 : vector<2x128xf32>
    %444 = vector.extract_strided_slice %442 {offsets = [0, 0], sizes = [2, 32], strides = [1, 1]} : vector<2x128xf32> to vector<2x32xf32>
    %445 = vector.extract_strided_slice %442 {offsets = [0, 32], sizes = [2, 32], strides = [1, 1]} : vector<2x128xf32> to vector<2x32xf32>
    %446 = vector.extract_strided_slice %442 {offsets = [0, 96], sizes = [2, 32], strides = [1, 1]} : vector<2x128xf32> to vector<2x32xf32>
    %447 = vector.extract_strided_slice %443 {offsets = [0, 64], sizes = [2, 32], strides = [1, 1]} : vector<2x128xf32> to vector<2x32xf32>
    %c0_269 = arith.constant 0 : index
    %c0_270 = arith.constant 0 : index
    %c0_271 = arith.constant 0 : index
    %448 = vector.load %arg8[%c0_269, %c0_270, %c0_271] : memref<2x2x32xf32, #tpu.memory_space<vmem>>, vector<1x2x32xf32>
    %449 = vector.shape_cast %448 : vector<1x2x32xf32> to vector<2x32xf32>
    %450 = arith.mulf %445, %449 : vector<2x32xf32>
    %451 = arith.mulf %444, %447 : vector<2x32xf32>
    %452 = arith.addf %450, %451 : vector<2x32xf32>
    %453 = math.tanh %452 : vector<2x32xf32>
    %454 = arith.mulf %446, %453 : vector<2x32xf32>
    %c0_272 = arith.constant 0 : index
    %c0_273 = arith.constant 0 : index
    %c0_274 = arith.constant 0 : index
    %455 = vector.load %arg8[%c0_272, %c0_273, %c0_274] : memref<2x2x32xf32, #tpu.memory_space<vmem>>, vector<1x2x32xf32>
    %456 = vector.shape_cast %455 : vector<1x2x32xf32> to vector<2x32xf32>
    %457 = vector.shape_cast %452 : vector<2x32xf32> to vector<1x2x32xf32>
    tpu.vector_store %arg8[%c0_272, %c0_273, %c0_274], %457 {strides = array<i32>} : memref<2x2x32xf32, #tpu.memory_space<vmem>>, vector<1x2x32xf32>,
    %c0_275 = arith.constant 0 : index
    %c0_276 = arith.constant 0 : index
    %c32_277 = arith.constant 32 : index
    %458 = vector.load %arg7[%c0_275, %c0_276, %c32_277] : memref<2x2x64xf32, #tpu.memory_space<vmem>>, vector<1x2x32xf32>
    %459 = vector.shape_cast %458 : vector<1x2x32xf32> to vector<2x32xf32>
    %460 = vector.shape_cast %454 : vector<2x32xf32> to vector<1x2x32xf32>
    tpu.vector_store %arg7[%c0_275, %c0_276, %c32_277], %460 {strides = array<i32>} : memref<2x2x64xf32, #tpu.memory_space<vmem>>, vector<1x2x32xf32>,
    %c1_278 = arith.constant 1 : index
    %c0_279 = arith.constant 0 : index
    %c0_280 = arith.constant 0 : index
    %461 = vector.load %arg7[%c1_278, %c0_279, %c0_280] : memref<2x2x64xf32, #tpu.memory_space<vmem>>, vector<1x2x32xf32>
    %462 = vector.shape_cast %461 : vector<1x2x32xf32> to vector<2x32xf32>
    %463 = vector.shape_cast %454 : vector<2x32xf32> to vector<1x2x32xf32>
    tpu.vector_store %arg7[%c1_278, %c0_279, %c0_280], %463 {strides = array<i32>} : memref<2x2x64xf32, #tpu.memory_space<vmem>>, vector<1x2x32xf32>,
    %c1_281 = arith.constant 1 : index
    %c0_282 = arith.constant 0 : index
    %c0_283 = arith.constant 0 : index
    %464 = vector.load %arg7[%c1_281, %c0_282, %c0_283] : memref<2x2x64xf32, #tpu.memory_space<vmem>>, vector<1x2x64xf32>
    %465 = vector.shape_cast %464 : vector<1x2x64xf32> to vector<2x64xf32>
    %466 = arith.truncf %465 : vector<2x64xf32> to vector<2x64xbf16>
    %c1_284 = arith.constant 1 : index
    %c0_285 = arith.constant 0 : index
    %c0_286 = arith.constant 0 : index
    %467 = vector.load %arg2[%c1_284, %c0_285, %c0_286] : memref<2x64x128xbf16, #tpu.memory_space<vmem>>, vector<1x64x128xbf16>
    %468 = vector.shape_cast %467 : vector<1x64x128xbf16> to vector<64x128xbf16>
    %cst_287 = arith.constant dense<0.000000e+00> : vector<2x128xf32>
    %469 = tpu.matmul %466, %468, %cst_287 {dimension_numbers = #tpu.dot_dimension_numbers<[1], [0], [0], [1], [0, 0, 1, 1], [], []>} : vector<2x64xbf16>, vector<64x128xbf16>, vector<2x128xf32> -> vector<2x128xf32>
    %470 = arith.addf %469, %10 : vector<2x128xf32>
    %471 = arith.negf %470 : vector<2x128xf32>
    %472 = math.exp %471 : vector<2x128xf32>
    %cst_288 = arith.constant 1.000000e+00 : f32
    %473 = vector.broadcast %cst_288 : f32 to vector<2x128xf32>
    %474 = arith.addf %473, %472 : vector<2x128xf32>
    %475 = arith.divf %473, %474 : vector<2x128xf32>
    %476 = math.tanh %470 : vector<2x128xf32>
    %477 = vector.extract_strided_slice %475 {offsets = [0, 0], sizes = [2, 32], strides = [1, 1]} : vector<2x128xf32> to vector<2x32xf32>
    %478 = vector.extract_strided_slice %475 {offsets = [0, 32], sizes = [2, 32], strides = [1, 1]} : vector<2x128xf32> to vector<2x32xf32>
    %479 = vector.extract_strided_slice %475 {offsets = [0, 96], sizes = [2, 32], strides = [1, 1]} : vector<2x128xf32> to vector<2x32xf32>
    %480 = vector.extract_strided_slice %476 {offsets = [0, 64], sizes = [2, 32], strides = [1, 1]} : vector<2x128xf32> to vector<2x32xf32>
    %c1_289 = arith.constant 1 : index
    %c0_290 = arith.constant 0 : index
    %c0_291 = arith.constant 0 : index
    %481 = vector.load %arg8[%c1_289, %c0_290, %c0_291] : memref<2x2x32xf32, #tpu.memory_space<vmem>>, vector<1x2x32xf32>
    %482 = vector.shape_cast %481 : vector<1x2x32xf32> to vector<2x32xf32>
    %483 = arith.mulf %478, %482 : vector<2x32xf32>
    %484 = arith.mulf %477, %480 : vector<2x32xf32>
    %485 = arith.addf %483, %484 : vector<2x32xf32>
    %486 = math.tanh %485 : vector<2x32xf32>
    %487 = arith.mulf %479, %486 : vector<2x32xf32>
    %c1_292 = arith.constant 1 : index
    %c0_293 = arith.constant 0 : index
    %c0_294 = arith.constant 0 : index
    %488 = vector.load %arg8[%c1_292, %c0_293, %c0_294] : memref<2x2x32xf32, #tpu.memory_space<vmem>>, vector<1x2x32xf32>
    %489 = vector.shape_cast %488 : vector<1x2x32xf32> to vector<2x32xf32>
    %490 = vector.shape_cast %485 : vector<2x32xf32> to vector<1x2x32xf32>
    tpu.vector_store %arg8[%c1_292, %c0_293, %c0_294], %490 {strides = array<i32>} : memref<2x2x32xf32, #tpu.memory_space<vmem>>, vector<1x2x32xf32>,
    %c1_295 = arith.constant 1 : index
    %c0_296 = arith.constant 0 : index
    %c32_297 = arith.constant 32 : index
    %491 = vector.load %arg7[%c1_295, %c0_296, %c32_297] : memref<2x2x64xf32, #tpu.memory_space<vmem>>, vector<1x2x32xf32>
    %492 = vector.shape_cast %491 : vector<1x2x32xf32> to vector<2x32xf32>
    %493 = vector.shape_cast %487 : vector<2x32xf32> to vector<1x2x32xf32>
    tpu.vector_store %arg7[%c1_295, %c0_296, %c32_297], %493 {strides = array<i32>} : memref<2x2x64xf32, #tpu.memory_space<vmem>>, vector<1x2x32xf32>,
    %c7_i32 = arith.constant 7 : i32
    %494 = arith.index_cast %c7_i32 : i32 to index
    %c0_298 = arith.constant 0 : index
    %c0_299 = arith.constant 0 : index
    %495 = vector.load %arg1[%494, %c0_298, %c0_299] : memref<8x2x4xf32, #tpu.memory_space<vmem>>, vector<1x2x4xf32>
    %496 = vector.shape_cast %495 : vector<1x2x4xf32> to vector<2x4xf32>
    %c0_300 = arith.constant 0 : index
    %c0_301 = arith.constant 0 : index
    %c0_302 = arith.constant 0 : index
    %497 = vector.load %arg7[%c0_300, %c0_301, %c0_302] : memref<2x2x64xf32, #tpu.memory_space<vmem>>, vector<1x2x4xf32>
    %498 = vector.shape_cast %497 : vector<1x2x4xf32> to vector<2x4xf32>
    %499 = vector.shape_cast %496 : vector<2x4xf32> to vector<1x2x4xf32>
    tpu.vector_store %arg7[%c0_300, %c0_301, %c0_302], %499 {strides = array<i32>} : memref<2x2x64xf32, #tpu.memory_space<vmem>>, vector<1x2x4xf32>,
    %c0_303 = arith.constant 0 : index
    %c0_304 = arith.constant 0 : index
    %c0_305 = arith.constant 0 : index
    %500 = vector.load %arg7[%c0_303, %c0_304, %c0_305] : memref<2x2x64xf32, #tpu.memory_space<vmem>>, vector<1x2x64xf32>
    %501 = vector.shape_cast %500 : vector<1x2x64xf32> to vector<2x64xf32>
    %502 = arith.truncf %501 : vector<2x64xf32> to vector<2x64xbf16>
    %c0_306 = arith.constant 0 : index
    %c0_307 = arith.constant 0 : index
    %c0_308 = arith.constant 0 : index
    %503 = vector.load %arg2[%c0_306, %c0_307, %c0_308] : memref<2x64x128xbf16, #tpu.memory_space<vmem>>, vector<1x64x128xbf16>
    %504 = vector.shape_cast %503 : vector<1x64x128xbf16> to vector<64x128xbf16>
    %cst_309 = arith.constant dense<0.000000e+00> : vector<2x128xf32>
    %505 = tpu.matmul %502, %504, %cst_309 {dimension_numbers = #tpu.dot_dimension_numbers<[1], [0], [0], [1], [0, 0, 1, 1], [], []>} : vector<2x64xbf16>, vector<64x128xbf16>, vector<2x128xf32> -> vector<2x128xf32>
    %506 = arith.addf %505, %6 : vector<2x128xf32>
    %507 = arith.negf %506 : vector<2x128xf32>
    %508 = math.exp %507 : vector<2x128xf32>
    %cst_310 = arith.constant 1.000000e+00 : f32
    %509 = vector.broadcast %cst_310 : f32 to vector<2x128xf32>
    %510 = arith.addf %509, %508 : vector<2x128xf32>
    %511 = arith.divf %509, %510 : vector<2x128xf32>
    %512 = math.tanh %506 : vector<2x128xf32>
    %513 = vector.extract_strided_slice %511 {offsets = [0, 0], sizes = [2, 32], strides = [1, 1]} : vector<2x128xf32> to vector<2x32xf32>
    %514 = vector.extract_strided_slice %511 {offsets = [0, 32], sizes = [2, 32], strides = [1, 1]} : vector<2x128xf32> to vector<2x32xf32>
    %515 = vector.extract_strided_slice %511 {offsets = [0, 96], sizes = [2, 32], strides = [1, 1]} : vector<2x128xf32> to vector<2x32xf32>
    %516 = vector.extract_strided_slice %512 {offsets = [0, 64], sizes = [2, 32], strides = [1, 1]} : vector<2x128xf32> to vector<2x32xf32>
    %c0_311 = arith.constant 0 : index
    %c0_312 = arith.constant 0 : index
    %c0_313 = arith.constant 0 : index
    %517 = vector.load %arg8[%c0_311, %c0_312, %c0_313] : memref<2x2x32xf32, #tpu.memory_space<vmem>>, vector<1x2x32xf32>
    %518 = vector.shape_cast %517 : vector<1x2x32xf32> to vector<2x32xf32>
    %519 = arith.mulf %514, %518 : vector<2x32xf32>
    %520 = arith.mulf %513, %516 : vector<2x32xf32>
    %521 = arith.addf %519, %520 : vector<2x32xf32>
    %522 = math.tanh %521 : vector<2x32xf32>
    %523 = arith.mulf %515, %522 : vector<2x32xf32>
    %c0_314 = arith.constant 0 : index
    %c0_315 = arith.constant 0 : index
    %c0_316 = arith.constant 0 : index
    %524 = vector.load %arg8[%c0_314, %c0_315, %c0_316] : memref<2x2x32xf32, #tpu.memory_space<vmem>>, vector<1x2x32xf32>
    %525 = vector.shape_cast %524 : vector<1x2x32xf32> to vector<2x32xf32>
    %526 = vector.shape_cast %521 : vector<2x32xf32> to vector<1x2x32xf32>
    tpu.vector_store %arg8[%c0_314, %c0_315, %c0_316], %526 {strides = array<i32>} : memref<2x2x32xf32, #tpu.memory_space<vmem>>, vector<1x2x32xf32>,
    %c0_317 = arith.constant 0 : index
    %c0_318 = arith.constant 0 : index
    %c32_319 = arith.constant 32 : index
    %527 = vector.load %arg7[%c0_317, %c0_318, %c32_319] : memref<2x2x64xf32, #tpu.memory_space<vmem>>, vector<1x2x32xf32>
    %528 = vector.shape_cast %527 : vector<1x2x32xf32> to vector<2x32xf32>
    %529 = vector.shape_cast %523 : vector<2x32xf32> to vector<1x2x32xf32>
    tpu.vector_store %arg7[%c0_317, %c0_318, %c32_319], %529 {strides = array<i32>} : memref<2x2x64xf32, #tpu.memory_space<vmem>>, vector<1x2x32xf32>,
    %c1_320 = arith.constant 1 : index
    %c0_321 = arith.constant 0 : index
    %c0_322 = arith.constant 0 : index
    %530 = vector.load %arg7[%c1_320, %c0_321, %c0_322] : memref<2x2x64xf32, #tpu.memory_space<vmem>>, vector<1x2x32xf32>
    %531 = vector.shape_cast %530 : vector<1x2x32xf32> to vector<2x32xf32>
    %532 = vector.shape_cast %523 : vector<2x32xf32> to vector<1x2x32xf32>
    tpu.vector_store %arg7[%c1_320, %c0_321, %c0_322], %532 {strides = array<i32>} : memref<2x2x64xf32, #tpu.memory_space<vmem>>, vector<1x2x32xf32>,
    %c1_323 = arith.constant 1 : index
    %c0_324 = arith.constant 0 : index
    %c0_325 = arith.constant 0 : index
    %533 = vector.load %arg7[%c1_323, %c0_324, %c0_325] : memref<2x2x64xf32, #tpu.memory_space<vmem>>, vector<1x2x64xf32>
    %534 = vector.shape_cast %533 : vector<1x2x64xf32> to vector<2x64xf32>
    %535 = arith.truncf %534 : vector<2x64xf32> to vector<2x64xbf16>
    %c1_326 = arith.constant 1 : index
    %c0_327 = arith.constant 0 : index
    %c0_328 = arith.constant 0 : index
    %536 = vector.load %arg2[%c1_326, %c0_327, %c0_328] : memref<2x64x128xbf16, #tpu.memory_space<vmem>>, vector<1x64x128xbf16>
    %537 = vector.shape_cast %536 : vector<1x64x128xbf16> to vector<64x128xbf16>
    %cst_329 = arith.constant dense<0.000000e+00> : vector<2x128xf32>
    %538 = tpu.matmul %535, %537, %cst_329 {dimension_numbers = #tpu.dot_dimension_numbers<[1], [0], [0], [1], [0, 0, 1, 1], [], []>} : vector<2x64xbf16>, vector<64x128xbf16>, vector<2x128xf32> -> vector<2x128xf32>
    %539 = arith.addf %538, %10 : vector<2x128xf32>
    %540 = arith.negf %539 : vector<2x128xf32>
    %541 = math.exp %540 : vector<2x128xf32>
    %cst_330 = arith.constant 1.000000e+00 : f32
    %542 = vector.broadcast %cst_330 : f32 to vector<2x128xf32>
    %543 = arith.addf %542, %541 : vector<2x128xf32>
    %544 = arith.divf %542, %543 : vector<2x128xf32>
    %545 = math.tanh %539 : vector<2x128xf32>
    %546 = vector.extract_strided_slice %544 {offsets = [0, 0], sizes = [2, 32], strides = [1, 1]} : vector<2x128xf32> to vector<2x32xf32>
    %547 = vector.extract_strided_slice %544 {offsets = [0, 32], sizes = [2, 32], strides = [1, 1]} : vector<2x128xf32> to vector<2x32xf32>
    %548 = vector.extract_strided_slice %544 {offsets = [0, 96], sizes = [2, 32], strides = [1, 1]} : vector<2x128xf32> to vector<2x32xf32>
    %549 = vector.extract_strided_slice %545 {offsets = [0, 64], sizes = [2, 32], strides = [1, 1]} : vector<2x128xf32> to vector<2x32xf32>
    %c1_331 = arith.constant 1 : index
    %c0_332 = arith.constant 0 : index
    %c0_333 = arith.constant 0 : index
    %550 = vector.load %arg8[%c1_331, %c0_332, %c0_333] : memref<2x2x32xf32, #tpu.memory_space<vmem>>, vector<1x2x32xf32>
    %551 = vector.shape_cast %550 : vector<1x2x32xf32> to vector<2x32xf32>
    %552 = arith.mulf %547, %551 : vector<2x32xf32>
    %553 = arith.mulf %546, %549 : vector<2x32xf32>
    %554 = arith.addf %552, %553 : vector<2x32xf32>
    %555 = math.tanh %554 : vector<2x32xf32>
    %556 = arith.mulf %548, %555 : vector<2x32xf32>
    %c1_334 = arith.constant 1 : index
    %c0_335 = arith.constant 0 : index
    %c0_336 = arith.constant 0 : index
    %557 = vector.load %arg8[%c1_334, %c0_335, %c0_336] : memref<2x2x32xf32, #tpu.memory_space<vmem>>, vector<1x2x32xf32>
    %558 = vector.shape_cast %557 : vector<1x2x32xf32> to vector<2x32xf32>
    %559 = vector.shape_cast %554 : vector<2x32xf32> to vector<1x2x32xf32>
    tpu.vector_store %arg8[%c1_334, %c0_335, %c0_336], %559 {strides = array<i32>} : memref<2x2x32xf32, #tpu.memory_space<vmem>>, vector<1x2x32xf32>,
    %c1_337 = arith.constant 1 : index
    %c0_338 = arith.constant 0 : index
    %c32_339 = arith.constant 32 : index
    %560 = vector.load %arg7[%c1_337, %c0_338, %c32_339] : memref<2x2x64xf32, #tpu.memory_space<vmem>>, vector<1x2x32xf32>
    %561 = vector.shape_cast %560 : vector<1x2x32xf32> to vector<2x32xf32>
    %562 = vector.shape_cast %556 : vector<2x32xf32> to vector<1x2x32xf32>
    tpu.vector_store %arg7[%c1_337, %c0_338, %c32_339], %562 {strides = array<i32>} : memref<2x2x64xf32, #tpu.memory_space<vmem>>, vector<1x2x32xf32>,
    %c8_i32 = arith.constant 8 : i32
    %c1_i32_340 = arith.constant 1 : i32
    %563 = arith.cmpi eq, %arg0, %c1_i32_340 : i32
    %564 = arith.extui %563 : i1 to i32
    %c0_i32_341 = arith.constant 0 : i32
    %565 = arith.cmpi ne, %564, %c0_i32_341 : i32
    scf.if %565 {
      %c1_342 = arith.constant 1 : index
      %c0_343 = arith.constant 0 : index
      %c32_344 = arith.constant 32 : index
      %566 = vector.load %arg7[%c1_342, %c0_343, %c32_344] : memref<2x2x64xf32, #tpu.memory_space<vmem>>, vector<1x2x32xf32>
      %567 = vector.shape_cast %566 : vector<1x2x32xf32> to vector<2x32xf32>
      %568 = arith.truncf %567 : vector<2x32xf32> to vector<2x32xbf16>
      %c0_345 = arith.constant 0 : index
      %c0_346 = arith.constant 0 : index
      %569 = vector.load %arg4[%c0_345, %c0_346] : memref<32x128xbf16, #tpu.memory_space<vmem>>, vector<32x128xbf16>
      %cst_347 = arith.constant dense<0.000000e+00> : vector<2x128xf32>
      %570 = tpu.matmul %568, %569, %cst_347 {dimension_numbers = #tpu.dot_dimension_numbers<[1], [0], [0], [1], [0, 0, 1, 1], [], []>} : vector<2x32xbf16>, vector<32x128xbf16>, vector<2x128xf32> -> vector<2x128xf32>
      %c0_348 = arith.constant 0 : index
      %c0_349 = arith.constant 0 : index
      %571 = vector.load %arg5[%c0_348, %c0_349] : memref<1x128xf32, #tpu.memory_space<vmem>>, vector<1x128xf32>
      %572 = vector.broadcast %571 : vector<1x128xf32> to vector<2x128xf32>
      %573 = arith.addf %570, %572 : vector<2x128xf32>
      %c0_350 = arith.constant 0 : index
      %c0_351 = arith.constant 0 : index
      %574 = vector.load %arg6[%c0_350, %c0_351] : memref<2x128xf32, #tpu.memory_space<vmem>>, vector<2x128xf32>
      tpu.vector_store %arg6[%c0_350, %c0_351], %573 {strides = array<i32>} : memref<2x128xf32, #tpu.memory_space<vmem>>, vector<2x128xf32>,
    } else {
    }
    return
  }
  func.func @transform_0(%arg0: i32) -> (i32, i32, i32) {
    %c0_i32 = arith.constant 0 : i32
    %c0_i32_0 = arith.constant 0 : i32
    %c0_i32_1 = arith.constant 0 : i32
    return %arg0, %c0_i32, %c0_i32_0 : i32, i32, i32
  }
  func.func @transform_1(%arg0: i32) -> (i32, i32, i32) {
    %c0_i32 = arith.constant 0 : i32
    %c0_i32_0 = arith.constant 0 : i32
    %c0_i32_1 = arith.constant 0 : i32
    %c0_i32_2 = arith.constant 0 : i32
    return %c0_i32, %c0_i32_0, %c0_i32_1 : i32, i32, i32
  }
  func.func @transform_2(%arg0: i32) -> (i32, i32, i32) {
    %c0_i32 = arith.constant 0 : i32
    %c0_i32_0 = arith.constant 0 : i32
    %c0_i32_1 = arith.constant 0 : i32
    %c0_i32_2 = arith.constant 0 : i32
    return %c0_i32, %c0_i32_0, %c0_i32_1 : i32, i32, i32
  }
  func.func @transform_3(%arg0: i32) -> (i32, i32) {
    %c0_i32 = arith.constant 0 : i32
    %c0_i32_0 = arith.constant 0 : i32
    %c0_i32_1 = arith.constant 0 : i32
    return %c0_i32, %c0_i32_0 : i32, i32
  }
  func.func @transform_4(%arg0: i32) -> (i32, i32) {
    %c0_i32 = arith.constant 0 : i32
    %c0_i32_0 = arith.constant 0 : i32
    %c0_i32_1 = arith.constant 0 : i32
    return %c0_i32, %c0_i32_0 : i32, i32
  }
  func.func @transform_5(%arg0: i32) -> (i32, i32) {
    %c0_i32 = arith.constant 0 : i32
    %c0_i32_0 = arith.constant 0 : i32
    %c0_i32_1 = arith.constant 0 : i32
    return %c0_i32, %c0_i32_0 : i32, i32
  }
}

</mosaic_0001>

<bundles_post_ra>
// kernel: tpu_custom_call.1
= control target key start
LH: loop header
LB: loop body
LE: loop exit
PB: predicated region body
PF: predicated region fallthrough
CT: control target
= control target key end

     0   :  { %10 = vsyncpa [#allocation5], 0  ;;  %s3426_s0 = inlined_call_operand.vmem [shape: f32[16,2,4], index: 0, kind: input, shape index: {}]   ;;  %s3427_s1 = inlined_call_operand.hbm [shape: bf16[2,64,128], index: 1, kind: input, shape index: {}]   ;;  %s3428_s2 = inlined_call_operand.vmem [shape: f32[2,1,128], index: 2, kind: input, shape index: {}]   ;;  %s3429_s3 = inlined_call_operand.vmem [shape: bf16[32,128], index: 3, kind: input, shape index: {}]   ;;  %s3430_s4 = inlined_call_operand.vmem [shape: f32[1,128], index: 4, kind: input, shape index: {}]   ;;  %s3431_s5 = inlined_call_operand.hbm [shape: f32[2,128], index: 5, kind: output, shape index: {}]  }
   0x1   :  { %11 = vsyncpa [#allocation6], 0  ;;  %s3056_s18 = smov 0  }
   0x2 LB: > { %s3062_s19 = sadd.s32 4294967295, %s3011_s18   ;;  %p2308_p0 = scmp.ge.s32.totalorder %s3011_s18, 1  ;;  %s3011_s18 = sphi %s3056_s18, %s17_s18  }
   0x3   : > { %p153_p1 = scmp.lt.s32.totalorder %s3011_s18, 3  ;;  %s3013_s20 = smov [#allocation4]  }
   0x4   : > { %s165_s21 = sshll.u32 %s3013_s20, 4  ;;  %p2726_p4 = scmp.eq.s32.totalorder %s3062_s19, 0  ;;  %s166_s21 = int_to_ptr.vmem [resolvable:$true] %s165_s21 }
   0x5   : > { %p3067_p3 = pnand %p2308_p0, %p153_p1  ;;  %s2958_s23 = scalar_lea.vmem %s166_s21, 1024 }
   0x6   : > { %p2959_p8 = scmp.ne.s32.totalorder %s166_s21, %s2958_s23  ;;  %p2966_p11 = scmp.lt.s32.totalorder %s166_s21, %s166_s21 }
   0x7   : > { %p2722_p5 = pneg %p3067_p3  ;;  %p2967_p12 = scmp.lt.s32.totalorder %s2958_s23, %s2958_s23 }
   0x9   : > { %p2723_p6 = pnand %p2726_p4, %p2722_p5  ;;  %p2968_p13 = por %p2967_p12, %p2966_p11 }
   0xb   : > { %p2949_p7 = pneg %p2723_p6 }
   0xd   : > { %p2961_p9 = pnand %p2959_p8, %p2949_p7 }
   0xf   : > { %p2962_p10 = pneg %p2961_p9 }
  0x11   : > { %p2969_p2 = pnand %p2968_p13, %p2962_p10 }
  0x13   : > { %2972 = shalt.err (!%p2969_p2)
}
  0x14   : > { %s3014_s24 = smov 64   ;;  %s3015_s25 = smov 4  }
  0x15   : > { %2725 = dma.hbm_to_vmem [thread:$0]  (!%p2723_p6), %s3427_s1, 1024, %s166_s21, [#allocation5], %s3014_s24, %s3014_s24, %s3015_s25  }
  0x16   : > { %199 = sbr.rel (%p3067_p3) target bundleno = 6700 (0x1a2c), region = 40 }
  0x1b   : > { %3002 = dma.done.wait (%p2726_p4), [#allocation5], 1024  }
  0x1c   : > { %3004 = vsyncadd (%p2726_p4), [#allocation5], 4294966272  ;;  %s2313_s28 = sshll.u32 %s3062_s19, 3  ;;  %p3433_p1 = scmp.ne.s32.totalorder %s3062_s19, 0 }
  0x1d   : > { %p223_p0 = scmp.lt.s32.totalorder %s2313_s28, 15 }
  0x1e   : > { %232 = sbr.rel (%p3433_p1) target bundleno = 38 (0x26), region = 48 }
  0x1f   : > { %s3435_s28 = smov (!%p223_p0, %s2313_s28), 15 }
  0x20   : > { %s2314_s29 = sshll.u32 %s3435_s28, 1 }
  0x21   : > { %s3089_s7 = scalar_lea.vmem %s3426_s0, %s2314_s29 }
  0x23   : > { %vm233_vm0 = vcmask 517120   ;;  %vm236_vm1 = vcmask 254976   ;;  %v3016_v0 = vmov 0.0  }
  0x24   : > { %234 = vst.msk [vmem:[#allocation2] sm:$0x3] %vm233_vm0, %v3016_v0  ;;  %235 = vst.msk [vmem:[#allocation2 + $0x2] sm:$0x3] %vm233_vm0, %v3016_v0 }
  0x25   : > { %237 = vst.msk [vmem:[#allocation3] sm:$0x3] %vm236_vm1, %v3016_v0  ;;  %238 = vst.msk [vmem:[#allocation3 + $0x2] sm:$0x3] %vm236_vm1, %v3016_v0 }
  0x26 PF: > { %v2751_v1 = vld [vmem:[#allocation4 + $0x18] sm:$0xff]   ;;  %v3017_v2 = vmov 0.0   ;;  %v2752_v3 = vld [vmem:[#allocation4 + $0x10] sm:$0xff]   ;;  %vm3018_vm2 = vmmov 0   ;;  %vm255_vm3 = vcmask 25600   ;;  %v2753_v4 = vld [vmem:[#allocation4 + $0x8] sm:$0xff]  }
  0x27   : > { %2514 = vmatprep.subr.bf16.mxu0 %v3017_v2  ;;  %2526 = vmatprep.subr.bf16.mxu1 %v3017_v2  ;;  %v254_v5 = vld [vmem:[%s3089_s7] sm:$0x3]  ;;  %vm291_vm4 = vcmask 523264   ;;  %v2754_v6 = vld [vmem:[#allocation4] sm:$0xff]   ;;  %s3019_s10 = smov 64   ;;  %s3020_s11 = smov 32  }
  0x28   : > { %2515 = vmatpush3.bf16.msra.mxu0 %v2751_v1  ;;  %2522 = vmatprep.mubr.msk.bf16.mxu0 %vm3018_vm2, %v3017_v2  ;;  %256 = vst.msk [vmem:[#allocation2] sm:$0x3] %vm255_vm3, %v254_v5  ;;  %v3111_v9 = vld [vmem:[%s3428_s2] ss:$0 sm:$0xff]  ;;  %v2757_v29 = vld [vmem:[#allocation4 + $0x30] sm:$0xff]   ;;  %v2759_v32 = vld [vmem:[#allocation4 + $0x28] sm:$0xff]  }
  0x29   : > { %2516 = vmatprep.subr.bf16.mxu0 %v3017_v2  ;;  %2534 = vmatprep.mubr.msk.bf16.mxu1 %vm3018_vm2, %v3017_v2  ;;  %v2755_v27 = vld [vmem:[#allocation4 + $0x38] sm:$0xff]   ;;  %v2758_v31 = vld [vmem:[#allocation4 + $0x10] sm:$0xff]   ;;  %v2760_v33 = vld [vmem:[#allocation4 + $0x8] sm:$0xff]   ;;  %s3021_s12 = smov 96   ;;  %vm368_vm5 = vcmask 254976   ;;  %vm374_vm6 = vcmask 517376  }
  0x2a   : > { %v2756_v28 = vld [vmem:[#allocation4 + $0x18] sm:$0xff]   ;;  %2527 = vmatpush3.bf16.msra.mxu1 %v2755_v27  ;;  %v2761_v34 = vld [vmem:[#allocation4 + $0x20] sm:$0xff]   ;;  %p2422_p2 = scmp.ne.s32.totalorder %s3062_s19, 1 }
  0x2b   : > { %2528 = vmatprep.subr.bf16.mxu1 %v3017_v2  ;;  %v2762_v35 = vld [vmem:[#allocation4] sm:$0xff]   ;;  %v2331_v38 = vld [vmem:[%s3089_s7 + $0x2] sm:$0x3]  ;;  %v3143_v46 = vld [vmem:[%s3428_s2 + $0x1] ss:$0 sm:$0xff]  ;;  %s3024_s23 = smov (!%p2422_p2), 96  }
  0x2c   : > { %2517 = vmatpush3.bf16.msra.mxu0 %v2752_v3  ;;  %v342_v16 = vld [vmem:[#allocation3] sm:$0x3]  ;;  %v467_v59 = vld [vmem:[#allocation3 + $0x2] sm:$0x3]  ;;  %v2769_v27 = vld [vmem:[#allocation4] sm:$0xff]  }
  0x2d   : > { %2518 = vmatprep.subr.bf16.mxu0 %v3017_v2 }
  0x2e   : > { %2529 = vmatpush3.bf16.msra.mxu1 %v2757_v29 }
  0x2f   : > { %v257_v7 = vld [vmem:[#allocation2] sm:$0x3]  ;;  %2530 = vmatprep.subr.bf16.mxu1 %v3017_v2 }
  0x30   : > { %2519 = vmatpush3.bf16.msra.mxu0 %v2753_v4  ;;  %v258_v8 = vpack.c.bf16 %v257_v7, %v257_v7 }
  0x31   : > { %2520 = vmatprep.subr.bf16.mxu0 %v3017_v2 }
  0x32   : > { %2531 = vmatpush3.bf16.msra.mxu1 %v2759_v32 }
  0x33   : > { %2532 = vmatprep.subr.bf16.mxu1 %v3017_v2 }
  0x34   : > { %2521 = vmatpush3.bf16.msra.mxu0 %v2754_v6 }
  0x35   : > { %2538 = vmatprep.subr.bf16.mxu0 %v3017_v2 }
  0x36   : > { %2533 = vmatpush3.bf16.msra.mxu1 %v2761_v34  ;;  %v2344_v34 = vld [vmem:[%s3089_s7 + $0x4] sm:$0x3] }
  0x37   : > { %2523 = vmatmul.mubr.msk.bf16.vlgmr.msra.gmra.mxu0 %vm291_vm4, %v258_v8  ;;  %2550 = vmatprep.subr.bf16.mxu1 %v3017_v2 }
  0x38   : > { %2546 = vmatprep.mubr.msk.bf16.mxu0 %vm3018_vm2, %v3017_v2  ;;  %2539 = vmatpush3.bf16.msra.mxu0 %v2756_v28  ;;  %v2770_v28 = vld [vmem:[#allocation4 + $0x20] sm:$0xff]  }
  0x39   : > { %2540 = vmatprep.subr.bf16.mxu0 %v3017_v2 }
  0x3c   : > { %2541 = vmatpush3.bf16.msra.mxu0 %v2758_v31 }
  0x3d   : > { %2542 = vmatprep.subr.bf16.mxu0 %v3017_v2 }
  0x40   : > { %2543 = vmatpush3.bf16.msra.mxu0 %v2760_v33 }
  0x41   : > { %2544 = vmatprep.subr.bf16.mxu0 %v3017_v2 }
  0x44   : > { %2545 = vmatpush3.bf16.msra.mxu0 %v2762_v35 }
  0x45   : > { %2562 = vmatprep.subr.bf16.mxu0 %v3017_v2 }
  0xf7   : > { %v329_v10 = vpop.f32.mrf.mxu0 }
  0xf8   : > { %v330_v11 = vadd.f32 %v3111_v9, %v329_v10 }
  0xf9   : > { %v2524_v12 = vpop.f32.mrf.mxu0 }
  0xfa   : > { %2815 = vtanh.f32 %v330_v11  ;;  %v2324_v17 = vmul.f32 -1.442695, %v330_v11 }
  0xfb   : > { %v332_v13 = vpop.f32.mrf.mxu0 }
  0xfc   : > { %2817 = vpow2.f32 %v2324_v17 }
  0xfd   : > { %v2525_v14 = vpop.f32.mrf.mxu0 }
 0x107   : > { %v2816_v15 = vpop.eup %2815 }
 0x108   : > { %349 = vrot.lane.b32.xlu0 %v2816_v15, %s3019_s10 }
 0x109   : > { %v2818_v18 = vpop.eup %2817 }
 0x10a   : > { %v338_v19 = vadd.f32 1.0, %v2818_v18 }
 0x10c   : > { %344 = vrot.lane.b32.xlu0 %v342_v16, %s3020_s11  ;;  %2819 = vrcp.f32 %v338_v19  ;;  %v2763_v19 = vld [vmem:[#allocation4 + $0x18] sm:$0xff]  }
 0x119   : > { %v2820_v20 = vpop.eup %2819 }
 0x17a   : > { %v350_v21 = vpop.permute.xlu0 %349 }
 0x17b   : > { %v352_v22 = vmul.f32 %v2820_v20, %v350_v21 }
 0x17d   : > { %354 = vrot.lane.b32.xlu1 %v352_v22, %s3020_s11 }
 0x17e   : > { %v345_v23 = vpop.permute.xlu0 %344 }
 0x17f   : > { %v347_v24 = vmul.f32 %v2820_v20, %v345_v23  ;;  %v2765_v23 = vld [vmem:[#allocation4 + $0x10] sm:$0xff]  }
 0x1ef   : > { %v355_v25 = vpop.permute.xlu1 %354 }
 0x1f0   : > { %v357_v26 = vadd.f32 %v355_v25, %v347_v24  ;;  %v2766_v24 = vld [vmem:[#allocation4 + $0x30] sm:$0xff]   ;;  %v2767_v25 = vld [vmem:[#allocation4 + $0x8] sm:$0xff]  }
 0x1f2   : > { %2821 = vtanh.f32 %v357_v26 }
 0x1ff   : > { %v2822_v30 = vpop.eup %2821 }
 0x200   : > { %360 = vrot.lane.b32.xlu1 %v2822_v30, %s3019_s10 }
 0x272   : > { %v361_v36 = vpop.permute.xlu1 %360 }
 0x273   : > { %v363_v37 = vmul.f32 %v2820_v20, %v361_v36  ;;  %v2764_v20 = vld [vmem:[#allocation4 + $0x38] sm:$0xff]  }
 0x275   : > { %376 = vrot.lane.b32.xlu1 %v363_v37, %s3020_s11  ;;  %371 = vrot.lane.b32.xlu0 %v363_v37, %s3019_s10 }
 0x279   : > { %365 = vrot.lane.b32.xlu0 %v357_v26, %s3021_s12  ;;  %v2768_v26 = vld [vmem:[#allocation4 + $0x28] sm:$0xff]  }
 0x2e7   : > { %v377_v39 = vpop.permute.xlu1 %376  ;;  %v372_v40 = vpop.permute.xlu0 %371 }
 0x2e8   : > { %380 = vst.msk [vmem:[#allocation2 + $0x2] sm:$0x3] %vm368_vm5, %v377_v39 }
 0x2e9   : > { %375 = vst.msk [vmem:[#allocation2] sm:$0x3] %vm374_vm6, %v372_v40 }
 0x2ea   : > { %501 = vst.msk [vmem:[#allocation2] sm:$0x3] %vm255_vm3, %v2331_v38 }
 0x2eb   : > { %v366_v41 = vpop.permute.xlu0 %365 }
 0x2ec   : > { %369 = vst.msk [vmem:[#allocation3] sm:$0x3] %vm368_vm5, %v366_v41 }
 0x2ef   : > { %v381_v42 = vld [vmem:[#allocation2 + $0x2] sm:$0x3] }
 0x2f0   : > { %v382_v44 = vpack.c.bf16 %v381_v42, %v381_v42 }
 0x2f1   : > { %v502_v43 = vld [vmem:[#allocation2] sm:$0x3] }
 0x2f2   : > { %v503_v45 = vpack.c.bf16 %v502_v43, %v502_v43  ;;  %2535 = vmatmul.mubr.msk.bf16.vlgmr.msra.gmra.mxu1 %vm291_vm4, %v382_v44 }
 0x2f3   : > { %2558 = vmatprep.mubr.msk.bf16.mxu1 %vm3018_vm2, %v3017_v2  ;;  %v586_v60 = vld [vmem:[#allocation3] sm:$0x3]  ;;  %2551 = vmatpush3.bf16.msra.mxu1 %v2764_v20 }
 0x2f4   : > { %2547 = vmatmul.mubr.msk.bf16.vlgmr.msra.gmra.mxu0 %vm291_vm4, %v503_v45  ;;  %2552 = vmatprep.subr.bf16.mxu1 %v3017_v2  ;;  %v2773_v20 = vld [vmem:[#allocation4 + $0x38] sm:$0xff]  }
 0x2f5   : > { %2570 = vmatprep.mubr.msk.bf16.mxu0 %vm3018_vm2, %v3017_v2  ;;  %2563 = vmatpush3.bf16.msra.mxu0 %v2763_v19  ;;  %v2772_v19 = vld [vmem:[#allocation4 + $0x10] sm:$0xff]  }
 0x2f6   : > { %2564 = vmatprep.subr.bf16.mxu0 %v3017_v2 }
 0x2f7   : > { %2553 = vmatpush3.bf16.msra.mxu1 %v2766_v24  ;;  %v2777_v24 = vld [vmem:[#allocation4 + $0x28] sm:$0xff]  }
 0x2f8   : > { %2554 = vmatprep.subr.bf16.mxu1 %v3017_v2 }
 0x2f9   : > { %2565 = vmatpush3.bf16.msra.mxu0 %v2765_v23  ;;  %v2776_v23 = vld [vmem:[#allocation4] sm:$0xff]  }
 0x2fa   : > { %2566 = vmatprep.subr.bf16.mxu0 %v3017_v2 }
 0x2fb   : > { %2555 = vmatpush3.bf16.msra.mxu1 %v2768_v26 }
 0x2fc   : > { %2556 = vmatprep.subr.bf16.mxu1 %v3017_v2 }
 0x2fd   : > { %2567 = vmatpush3.bf16.msra.mxu0 %v2767_v25 }
 0x2fe   : > { %2568 = vmatprep.subr.bf16.mxu0 %v3017_v2 }
 0x2ff   : > { %2557 = vmatpush3.bf16.msra.mxu1 %v2770_v28 }
 0x300   : > { %2574 = vmatprep.subr.bf16.mxu1 %v3017_v2 }
 0x301   : > { %2569 = vmatpush3.bf16.msra.mxu0 %v2769_v27  ;;  %v2778_v27 = vld [vmem:[#allocation4 + $0x20] sm:$0xff]  }
 0x302   : > { %2586 = vmatprep.subr.bf16.mxu0 %v3017_v2 }
 0x3b2   : > { %v453_v47 = vpop.f32.mrf.mxu1 }
 0x3b3   : > { %v454_v48 = vadd.f32 %v3143_v46, %v453_v47 }
 0x3b4   : > { %v573_v49 = vpop.f32.mrf.mxu0  ;;  %v2536_v51 = vpop.f32.mrf.mxu1 }
 0x3b5   : > { %v574_v50 = vadd.f32 %v3111_v9, %v573_v49  ;;  %2823 = vtanh.f32 %v454_v48  ;;  %v2330_v61 = vmul.f32 -1.442695, %v454_v48 }
 0x3b6   : > { %v2548_v52 = vpop.f32.mrf.mxu0  ;;  %v456_v53 = vpop.f32.mrf.mxu1 }
 0x3b7   : > { %2825 = vtanh.f32 %v574_v50  ;;  %v2337_v62 = vmul.f32 -1.442695, %v574_v50 }
 0x3b8   : > { %v576_v54 = vpop.f32.mrf.mxu0  ;;  %v2537_v55 = vpop.f32.mrf.mxu1  ;;  %2827 = vpow2.f32 %v2330_v61 }
 0x3b9   : > { %2829 = vpow2.f32 %v2337_v62 }
 0x3ba   : > { %v2549_v56 = vpop.f32.mrf.mxu0 }
 0x3c2   : > { %v2824_v57 = vpop.eup %2823 }
 0x3c3   : > { %474 = vrot.lane.b32.xlu1 %v2824_v57, %s3019_s10 }
 0x3c4   : > { %v2826_v58 = vpop.eup %2825 }
 0x3c5   : > { %593 = vrot.lane.b32.xlu0 %v2826_v58, %s3019_s10  ;;  %v2828_v63 = vpop.eup %2827 }
 0x3c6   : > { %v2830_v0 = vpop.eup %2829  ;;  %v462_v1 = vadd.f32 1.0, %v2828_v63 }
 0x3c7   : > { %469 = vrot.lane.b32.xlu1 %v467_v59, %s3020_s11  ;;  %v582_v3 = vadd.f32 1.0, %v2830_v0 }
 0x3c8   : > { %2831 = vrcp.f32 %v462_v1 }
 0x3c9   : > { %588 = vrot.lane.b32.xlu0 %v586_v60, %s3020_s11  ;;  %2833 = vrcp.f32 %v582_v3 }
 0x3d5   : > { %v2832_v4 = vpop.eup %2831 }
 0x3d6   : > { %v2834_v6 = vpop.eup %2833 }
 0x435   : > { %v475_v5 = vpop.permute.xlu1 %474 }
 0x436   : > { %v477_v7 = vmul.f32 %v2832_v4, %v475_v5 }
 0x437   : > { %v594_v8 = vpop.permute.xlu0 %593 }
 0x438   : > { %v596_v10 = vmul.f32 %v2834_v6, %v594_v8  ;;  %479 = vrot.lane.b32.xlu1 %v477_v7, %s3020_s11 }
 0x439   : > { %v470_v11 = vpop.permute.xlu1 %469 }
 0x43a   : > { %598 = vrot.lane.b32.xlu0 %v596_v10, %s3020_s11  ;;  %v472_v13 = vmul.f32 %v2832_v4, %v470_v11 }
 0x43b   : > { %v589_v12 = vpop.permute.xlu0 %588 }
 0x43c   : > { %v591_v14 = vmul.f32 %v2834_v6, %v589_v12 }
 0x4aa   : > { %v480_v15 = vpop.permute.xlu1 %479 }
 0x4ab   : > { %v482_v16 = vadd.f32 %v480_v15, %v472_v13 }
 0x4ac   : > { %v599_v17 = vpop.permute.xlu0 %598 }
 0x4ad   : > { %v601_v18 = vadd.f32 %v599_v17, %v591_v14  ;;  %2835 = vtanh.f32 %v482_v16  ;;  %v2771_v17 = vld [vmem:[#allocation4 + $0x18] sm:$0xff]  }
 0x4af   : > { %2837 = vtanh.f32 %v601_v18 }
 0x4ba   : > { %v2836_v21 = vpop.eup %2835 }
 0x4bb   : > { %485 = vrot.lane.b32.xlu1 %v2836_v21, %s3019_s10  ;;  %v2774_v21 = vld [vmem:[#allocation4 + $0x8] sm:$0xff]  }
 0x4bc   : > { %v2838_v22 = vpop.eup %2837 }
 0x4bd   : > { %604 = vrot.lane.b32.xlu0 %v2838_v22, %s3019_s10  ;;  %v2775_v22 = vld [vmem:[#allocation4 + $0x30] sm:$0xff]  }
 0x52d   : > { %v486_v29 = vpop.permute.xlu1 %485 }
 0x52e   : > { %v488_v30 = vmul.f32 %v2832_v4, %v486_v29 }
 0x52f   : > { %v605_v31 = vpop.permute.xlu0 %604 }
 0x530   : > { %v607_v32 = vmul.f32 %v2834_v6, %v605_v31  ;;  %495 = vrot.lane.b32.xlu1 %v488_v30, %s3019_s10  ;;  %v2357_v30 = vld [vmem:[%s3089_s7 + $0x6] sm:$0x3] }
 0x532   : > { %614 = vrot.lane.b32.xlu0 %v607_v32, %s3019_s10 }
 0x534   : > { %618 = vrot.lane.b32.xlu1 %v607_v32, %s3020_s11 }
 0x536   : > { %490 = vrot.lane.b32.xlu0 %v482_v16, %s3021_s12 }
 0x538   : > { %609 = vrot.lane.b32.xlu1 %v601_v18, %s3021_s12 }
 0x5a2   : > { %v496_v33 = vpop.permute.xlu1 %495 }
 0x5a3   : > { %498 = vst.msk [vmem:[#allocation2 + $0x2] sm:$0x3] %vm374_vm6, %v496_v33 }
 0x5a4   : > { %v615_v35 = vpop.permute.xlu0 %614 }
 0x5a5   : > { %617 = vst.msk [vmem:[#allocation2] sm:$0x3] %vm374_vm6, %v615_v35 }
 0x5a6   : > { %740 = vst.msk [vmem:[#allocation2] sm:$0x3] %vm255_vm3, %v2344_v34  ;;  %v619_v36 = vpop.permute.xlu1 %618 }
 0x5a7   : > { %621 = vst.msk [vmem:[#allocation2 + $0x2] sm:$0x3] %vm368_vm5, %v619_v36 }
 0x5a8   : > { %v491_v37 = vpop.permute.xlu0 %490 }
 0x5a9   : > { %493 = vst.msk [vmem:[#allocation3 + $0x2] sm:$0x3] %vm368_vm5, %v491_v37 }
 0x5aa   : > { %v610_v38 = vpop.permute.xlu1 %609 }
 0x5ab   : > { %612 = vst.msk [vmem:[#allocation3] sm:$0x3] %vm368_vm5, %v610_v38 }
 0x5ad   : > { %v741_v39 = vld [vmem:[#allocation2] sm:$0x3] }
 0x5ae   : > { %v742_v40 = vpack.c.bf16 %v741_v39, %v741_v39  ;;  %v622_v41 = vld [vmem:[#allocation2 + $0x2] sm:$0x3] }
 0x5af   : > { %v623_v42 = vpack.c.bf16 %v622_v41, %v622_v41 }
 0x5b0   : > { %2571 = vmatmul.mubr.msk.bf16.vlgmr.msra.gmra.mxu0 %vm291_vm4, %v742_v40  ;;  %v706_v57 = vld [vmem:[#allocation3 + $0x2] sm:$0x3] }
 0x5b1   : > { %2594 = vmatprep.mubr.msk.bf16.mxu0 %vm3018_vm2, %v3017_v2  ;;  %2559 = vmatmul.mubr.msk.bf16.vlgmr.msra.gmra.mxu1 %vm291_vm4, %v623_v42 }
 0x5b2   : > { %2582 = vmatprep.mubr.msk.bf16.mxu1 %vm3018_vm2, %v3017_v2  ;;  %v825_v56 = vld [vmem:[#allocation3] sm:$0x3]  ;;  %2587 = vmatpush3.bf16.msra.mxu0 %v2771_v17 }
 0x5b3   : > { %2588 = vmatprep.subr.bf16.mxu0 %v3017_v2  ;;  %2575 = vmatpush3.bf16.msra.mxu1 %v2773_v20  ;;  %v2781_v17 = vld [vmem:[#allocation4 + $0x38] sm:$0xff]   ;;  %v2784_v20 = vld [vmem:[#allocation4] sm:$0xff]  }
 0x5b4   : > { %2576 = vmatprep.subr.bf16.mxu1 %v3017_v2 }
 0x5b6   : > { %2589 = vmatpush3.bf16.msra.mxu0 %v2772_v19  ;;  %v2783_v19 = vld [vmem:[#allocation4 + $0x30] sm:$0xff]  }
 0x5b7   : > { %2590 = vmatprep.subr.bf16.mxu0 %v3017_v2  ;;  %2577 = vmatpush3.bf16.msra.mxu1 %v2775_v22 }
 0x5b8   : > { %2578 = vmatprep.subr.bf16.mxu1 %v3017_v2 }
 0x5ba   : > { %2591 = vmatpush3.bf16.msra.mxu0 %v2774_v21 }
 0x5bb   : > { %2592 = vmatprep.subr.bf16.mxu0 %v3017_v2  ;;  %2579 = vmatpush3.bf16.msra.mxu1 %v2777_v24  ;;  %v2786_v24 = vld [vmem:[#allocation4 + $0x20] sm:$0xff]  }
 0x5bc   : > { %2580 = vmatprep.subr.bf16.mxu1 %v3017_v2 }
 0x5be   : > { %2593 = vmatpush3.bf16.msra.mxu0 %v2776_v23  ;;  %v2785_v23 = vld [vmem:[#allocation4 + $0x28] sm:$0xff]  }
 0x5bf   : > { %2610 = vmatprep.subr.bf16.mxu0 %v3017_v2  ;;  %2581 = vmatpush3.bf16.msra.mxu1 %v2778_v27  ;;  %v2370_v27 = vld [vmem:[%s3089_s7 + $0x8] sm:$0x3] }
 0x5c0   : > { %2598 = vmatprep.subr.bf16.mxu1 %v3017_v2 }
 0x670   : > { %v812_v43 = vpop.f32.mrf.mxu0 }
 0x671   : > { %v813_v44 = vadd.f32 %v3111_v9, %v812_v43  ;;  %v693_v45 = vpop.f32.mrf.mxu1 }
 0x672   : > { %v2572_v47 = vpop.f32.mrf.mxu0  ;;  %v694_v48 = vadd.f32 %v3143_v46, %v693_v45 }
 0x673   : > { %2839 = vtanh.f32 %v813_v44  ;;  %v2560_v49 = vpop.f32.mrf.mxu1  ;;  %v2350_v58 = vmul.f32 -1.442695, %v813_v44 }
 0x674   : > { %v815_v50 = vpop.f32.mrf.mxu0  ;;  %2841 = vtanh.f32 %v694_v48  ;;  %v2343_v59 = vmul.f32 -1.442695, %v694_v48 }
 0x675   : > { %v696_v51 = vpop.f32.mrf.mxu1  ;;  %2843 = vpow2.f32 %v2350_v58 }
 0x676   : > { %v2573_v52 = vpop.f32.mrf.mxu0  ;;  %2845 = vpow2.f32 %v2343_v59 }
 0x677   : > { %v2561_v53 = vpop.f32.mrf.mxu1 }
 0x680   : > { %v2840_v54 = vpop.eup %2839 }
 0x681   : > { %832 = vrot.lane.b32.xlu1 %v2840_v54, %s3019_s10  ;;  %v2842_v55 = vpop.eup %2841 }
 0x682   : > { %713 = vrot.lane.b32.xlu0 %v2842_v55, %s3019_s10  ;;  %v2844_v60 = vpop.eup %2843 }
 0x683   : > { %v2846_v61 = vpop.eup %2845  ;;  %v821_v62 = vadd.f32 1.0, %v2844_v60 }
 0x684   : > { %v702_v63 = vadd.f32 1.0, %v2846_v61 }
 0x685   : > { %827 = vrot.lane.b32.xlu1 %v825_v56, %s3020_s11  ;;  %2847 = vrcp.f32 %v821_v62 }
 0x686   : > { %708 = vrot.lane.b32.xlu0 %v706_v57, %s3020_s11  ;;  %2849 = vrcp.f32 %v702_v63 }
 0x692   : > { %v2848_v0 = vpop.eup %2847 }
 0x693   : > { %v2850_v4 = vpop.eup %2849 }
 0x6f3   : > { %v833_v1 = vpop.permute.xlu1 %832 }
 0x6f4   : > { %v835_v3 = vmul.f32 %v2848_v0, %v833_v1  ;;  %v714_v5 = vpop.permute.xlu0 %713 }
 0x6f5   : > { %v716_v6 = vmul.f32 %v2850_v4, %v714_v5 }
 0x6f6   : > { %837 = vrot.lane.b32.xlu1 %v835_v3, %s3020_s11 }
 0x6f7   : > { %718 = vrot.lane.b32.xlu0 %v716_v6, %s3020_s11  ;;  %v828_v7 = vpop.permute.xlu1 %827 }
 0x6f8   : > { %v830_v8 = vmul.f32 %v2848_v0, %v828_v7  ;;  %v709_v10 = vpop.permute.xlu0 %708 }
 0x6f9   : > { %v711_v13 = vmul.f32 %v2850_v4, %v709_v10 }
 0x768   : > { %v838_v11 = vpop.permute.xlu1 %837 }
 0x769   : > { %v840_v12 = vadd.f32 %v838_v11, %v830_v8  ;;  %v719_v14 = vpop.permute.xlu0 %718 }
 0x76a   : > { %v721_v15 = vadd.f32 %v719_v14, %v711_v13  ;;  %v2779_v14 = vld [vmem:[#allocation4 + $0x18] sm:$0xff]  }
 0x76b   : > { %2851 = vtanh.f32 %v840_v12 }
 0x76c   : > { %2853 = vtanh.f32 %v721_v15 }
 0x778   : > { %v2852_v16 = vpop.eup %2851 }
 0x779   : > { %843 = vrot.lane.b32.xlu1 %v2852_v16, %s3019_s10  ;;  %v2854_v18 = vpop.eup %2853  ;;  %v2780_v16 = vld [vmem:[#allocation4 + $0x10] sm:$0xff]  }
 0x77a   : > { %724 = vrot.lane.b32.xlu0 %v2854_v18, %s3019_s10  ;;  %v2782_v18 = vld [vmem:[#allocation4 + $0x8] sm:$0xff]  }
 0x7eb   : > { %v844_v25 = vpop.permute.xlu1 %843 }
 0x7ec   : > { %v846_v26 = vmul.f32 %v2848_v0, %v844_v25  ;;  %v725_v28 = vpop.permute.xlu0 %724 }
 0x7ed   : > { %v727_v29 = vmul.f32 %v2850_v4, %v725_v28 }
 0x7ee   : > { %853 = vrot.lane.b32.xlu1 %v846_v26, %s3019_s10 }
 0x7ef   : > { %734 = vrot.lane.b32.xlu0 %v727_v29, %s3019_s10 }
 0x7f2   : > { %729 = vrot.lane.b32.xlu1 %v721_v15, %s3021_s12 }
 0x7f3   : > { %857 = vrot.lane.b32.xlu0 %v846_v26, %s3020_s11 }
 0x7f7   : > { %848 = vrot.lane.b32.xlu0 %v840_v12, %s3021_s12 }
 0x860   : > { %v854_v31 = vpop.permute.xlu1 %853 }
 0x861   : > { %856 = vst.msk [vmem:[#allocation2] sm:$0x3] %vm374_vm6, %v854_v31  ;;  %v735_v32 = vpop.permute.xlu0 %734 }
 0x862   : > { %979 = vst.msk [vmem:[#allocation2] sm:$0x3] %vm255_vm3, %v2357_v30 }
 0x863   : > { %737 = vst.msk [vmem:[#allocation2 + $0x2] sm:$0x3] %vm374_vm6, %v735_v32 }
 0x864   : > { %v730_v33 = vpop.permute.xlu1 %729 }
 0x865   : > { %732 = vst.msk [vmem:[#allocation3 + $0x2] sm:$0x3] %vm368_vm5, %v730_v33  ;;  %v858_v34 = vpop.permute.xlu0 %857 }
 0x866   : > { %860 = vst.msk [vmem:[#allocation2 + $0x2] sm:$0x3] %vm368_vm5, %v858_v34 }
 0x869   : > { %v980_v35 = vld [vmem:[#allocation2] sm:$0x3]  ;;  %v849_v37 = vpop.permute.xlu0 %848 }
 0x86a   : > { %v981_v36 = vpack.c.bf16 %v980_v35, %v980_v35  ;;  %851 = vst.msk [vmem:[#allocation3] sm:$0x3] %vm368_vm5, %v849_v37 }
 0x86c   : > { %2595 = vmatmul.mubr.msk.bf16.vlgmr.msra.gmra.mxu0 %vm291_vm4, %v981_v36  ;;  %v945_v54 = vld [vmem:[#allocation3 + $0x2] sm:$0x3] }
 0x86d   : > { %2618 = vmatprep.mubr.msk.bf16.mxu0 %vm3018_vm2, %v3017_v2  ;;  %v861_v38 = vld [vmem:[#allocation2 + $0x2] sm:$0x3]  ;;  %2611 = vmatpush3.bf16.msra.mxu0 %v2779_v14  ;;  %v2789_v14 = vld [vmem:[#allocation4 + $0x8] sm:$0xff]  }
 0x86e   : > { %v862_v39 = vpack.c.bf16 %v861_v38, %v861_v38  ;;  %2612 = vmatprep.subr.bf16.mxu0 %v3017_v2 }
 0x870   : > { %2583 = vmatmul.mubr.msk.bf16.vlgmr.msra.gmra.mxu1 %vm291_vm4, %v862_v39 }
 0x871   : > { %2606 = vmatprep.mubr.msk.bf16.mxu1 %vm3018_vm2, %v3017_v2  ;;  %v1064_v52 = vld [vmem:[#allocation3] sm:$0x3]  ;;  %2613 = vmatpush3.bf16.msra.mxu0 %v2780_v16  ;;  %v2791_v16 = vld [vmem:[#allocation4] sm:$0xff]  }
 0x872   : > { %2614 = vmatprep.subr.bf16.mxu0 %v3017_v2  ;;  %2599 = vmatpush3.bf16.msra.mxu1 %v2781_v17  ;;  %v2792_v17 = vld [vmem:[#allocation4 + $0x30] sm:$0xff]  }
 0x873   : > { %2600 = vmatprep.subr.bf16.mxu1 %v3017_v2 }
 0x875   : > { %2615 = vmatpush3.bf16.msra.mxu0 %v2782_v18 }
 0x876   : > { %2616 = vmatprep.subr.bf16.mxu0 %v3017_v2  ;;  %2601 = vmatpush3.bf16.msra.mxu1 %v2783_v19 }
 0x877   : > { %2602 = vmatprep.subr.bf16.mxu1 %v3017_v2 }
 0x879   : > { %2617 = vmatpush3.bf16.msra.mxu0 %v2784_v20  ;;  %v2793_v20 = vld [vmem:[#allocation4 + $0x28] sm:$0xff]  }
 0x87a   : > { %2634 = vmatprep.subr.bf16.mxu0 %v3017_v2  ;;  %2603 = vmatpush3.bf16.msra.mxu1 %v2785_v23 }
 0x87b   : > { %2604 = vmatprep.subr.bf16.mxu1 %v3017_v2 }
 0x87e   : > { %2605 = vmatpush3.bf16.msra.mxu1 %v2786_v24  ;;  %v2383_v24 = vld [vmem:[%s3089_s7 + $0xa] sm:$0x3] }
 0x87f   : > { %2622 = vmatprep.subr.bf16.mxu1 %v3017_v2 }
 0x92c   : > { %v1051_v40 = vpop.f32.mrf.mxu0 }
 0x92d   : > { %v1052_v41 = vadd.f32 %v3111_v9, %v1051_v40 }
 0x92e   : > { %v2596_v42 = vpop.f32.mrf.mxu0 }
 0x92f   : > { %2855 = vtanh.f32 %v1052_v41  ;;  %v2363_v55 = vmul.f32 -1.442695, %v1052_v41 }
 0x930   : > { %v1054_v43 = vpop.f32.mrf.mxu0  ;;  %v932_v44 = vpop.f32.mrf.mxu1 }
 0x931   : > { %v933_v47 = vadd.f32 %v3143_v46, %v932_v44 }
 0x932   : > { %v2597_v45 = vpop.f32.mrf.mxu0  ;;  %v2584_v48 = vpop.f32.mrf.mxu1 }
 0x933   : > { %2857 = vtanh.f32 %v933_v47  ;;  %v2356_v56 = vmul.f32 -1.442695, %v933_v47 }
 0x934   : > { %v935_v49 = vpop.f32.mrf.mxu1  ;;  %2859 = vpow2.f32 %v2363_v55 }
 0x935   : > { %2861 = vpow2.f32 %v2356_v56 }
 0x936   : > { %v2585_v50 = vpop.f32.mrf.mxu1 }
 0x93c   : > { %v2856_v51 = vpop.eup %2855 }
 0x93d   : > { %1071 = vrot.lane.b32.xlu0 %v2856_v51, %s3019_s10 }
 0x940   : > { %v2858_v53 = vpop.eup %2857 }
 0x941   : > { %1066 = vrot.lane.b32.xlu0 %v1064_v52, %s3020_s11  ;;  %952 = vrot.lane.b32.xlu1 %v2858_v53, %s3019_s10  ;;  %v2860_v57 = vpop.eup %2859 }
 0x942   : > { %v1060_v58 = vadd.f32 1.0, %v2860_v57  ;;  %v2862_v59 = vpop.eup %2861 }
 0x943   : > { %v941_v60 = vadd.f32 1.0, %v2862_v59 }
 0x944   : > { %2863 = vrcp.f32 %v1060_v58 }
 0x945   : > { %947 = vrot.lane.b32.xlu1 %v945_v54, %s3020_s11  ;;  %2865 = vrcp.f32 %v941_v60 }
 0x951   : > { %v2864_v61 = vpop.eup %2863 }
 0x952   : > { %v2866_v0 = vpop.eup %2865 }
 0x9af   : > { %v1072_v62 = vpop.permute.xlu0 %1071 }
 0x9b0   : > { %v1074_v63 = vmul.f32 %v2864_v61, %v1072_v62 }
 0x9b2   : > { %1076 = vrot.lane.b32.xlu0 %v1074_v63, %s3020_s11 }
 0x9b3   : > { %v953_v1 = vpop.permute.xlu1 %952  ;;  %v1067_v4 = vpop.permute.xlu0 %1066 }
 0x9b4   : > { %v955_v3 = vmul.f32 %v2866_v0, %v953_v1  ;;  %v1069_v5 = vmul.f32 %v2864_v61, %v1067_v4 }
 0x9b6   : > { %957 = vrot.lane.b32.xlu1 %v955_v3, %s3020_s11 }
 0x9b7   : > { %v948_v8 = vpop.permute.xlu1 %947 }
 0x9b8   : > { %v950_v10 = vmul.f32 %v2866_v0, %v948_v8 }
 0xa24   : > { %v1077_v6 = vpop.permute.xlu0 %1076 }
 0xa25   : > { %v1079_v7 = vadd.f32 %v1077_v6, %v1069_v5 }
 0xa27   : > { %2867 = vtanh.f32 %v1079_v7 }
 0xa28   : > { %v958_v11 = vpop.permute.xlu1 %957 }
 0xa29   : > { %v960_v12 = vadd.f32 %v958_v11, %v950_v10  ;;  %v2787_v11 = vld [vmem:[#allocation4 + $0x18] sm:$0xff]  }
 0xa2b   : > { %2869 = vtanh.f32 %v960_v12 }
 0xa34   : > { %v2868_v13 = vpop.eup %2867 }
 0xa35   : > { %1082 = vrot.lane.b32.xlu0 %v2868_v13, %s3019_s10  ;;  %v2788_v13 = vld [vmem:[#allocation4 + $0x10] sm:$0xff]  }
 0xa38   : > { %v2870_v15 = vpop.eup %2869 }
 0xa39   : > { %963 = vrot.lane.b32.xlu1 %v2870_v15, %s3019_s10  ;;  %v2790_v15 = vld [vmem:[#allocation4 + $0x38] sm:$0xff]  }
 0xaa7   : > { %v1083_v21 = vpop.permute.xlu0 %1082 }
 0xaa8   : > { %v1085_v22 = vmul.f32 %v2864_v61, %v1083_v21  ;;  %v2794_v21 = vld [vmem:[#allocation4 + $0x20] sm:$0xff]  }
 0xaaa   : > { %1092 = vrot.lane.b32.xlu0 %v1085_v22, %s3019_s10 }
 0xaab   : > { %v964_v25 = vpop.permute.xlu1 %963 }
 0xaac   : > { %v966_v26 = vmul.f32 %v2866_v0, %v964_v25 }
 0xaae   : > { %968 = vrot.lane.b32.xlu0 %v960_v12, %s3021_s12  ;;  %973 = vrot.lane.b32.xlu1 %v966_v26, %s3019_s10 }
 0xab2   : > { %1096 = vrot.lane.b32.xlu1 %v1085_v22, %s3020_s11 }
 0xab6   : > { %1087 = vrot.lane.b32.xlu1 %v1079_v7, %s3021_s12 }
 0xb1c   : > { %v1093_v28 = vpop.permute.xlu0 %1092 }
 0xb1d   : > { %1095 = vst.msk [vmem:[#allocation2] sm:$0x3] %vm374_vm6, %v1093_v28 }
 0xb1e   : > { %1218 = vst.msk [vmem:[#allocation2] sm:$0x3] %vm255_vm3, %v2370_v27 }
 0xb20   : > { %v969_v29 = vpop.permute.xlu0 %968  ;;  %v974_v30 = vpop.permute.xlu1 %973 }
 0xb21   : > { %971 = vst.msk [vmem:[#allocation3 + $0x2] sm:$0x3] %vm368_vm5, %v969_v29 }
 0xb22   : > { %976 = vst.msk [vmem:[#allocation2 + $0x2] sm:$0x3] %vm374_vm6, %v974_v30 }
 0xb24   : > { %v1097_v32 = vpop.permute.xlu1 %1096 }
 0xb25   : > { %v1219_v31 = vld [vmem:[#allocation2] sm:$0x3]  ;;  %1099 = vst.msk [vmem:[#allocation2 + $0x2] sm:$0x3] %vm368_vm5, %v1097_v32 }
 0xb26   : > { %v1220_v33 = vpack.c.bf16 %v1219_v31, %v1219_v31 }
 0xb28   : > { %2619 = vmatmul.mubr.msk.bf16.vlgmr.msra.gmra.mxu0 %vm291_vm4, %v1220_v33  ;;  %v1088_v34 = vpop.permute.xlu1 %1087  ;;  %v1184_v51 = vld [vmem:[#allocation3 + $0x2] sm:$0x3] }
 0xb29   : > { %2642 = vmatprep.mubr.msk.bf16.mxu0 %vm3018_vm2, %v3017_v2  ;;  %1090 = vst.msk [vmem:[#allocation3] sm:$0x3] %vm368_vm5, %v1088_v34  ;;  %2635 = vmatpush3.bf16.msra.mxu0 %v2787_v11  ;;  %v2798_v11 = vld [vmem:[#allocation4] sm:$0xff]  }
 0xb2a   : > { %2636 = vmatprep.subr.bf16.mxu0 %v3017_v2 }
 0xb2c   : > { %v1100_v35 = vld [vmem:[#allocation2 + $0x2] sm:$0x3] }
 0xb2d   : > { %v1101_v36 = vpack.c.bf16 %v1100_v35, %v1100_v35  ;;  %2637 = vmatpush3.bf16.msra.mxu0 %v2788_v13 }
 0xb2e   : > { %2638 = vmatprep.subr.bf16.mxu0 %v3017_v2 }
 0xb2f   : > { %2607 = vmatmul.mubr.msk.bf16.vlgmr.msra.gmra.mxu1 %vm291_vm4, %v1101_v36 }
 0xb30   : > { %2630 = vmatprep.mubr.msk.bf16.mxu1 %vm3018_vm2, %v3017_v2  ;;  %v1303_v49 = vld [vmem:[#allocation3] sm:$0x3]  ;;  %2623 = vmatpush3.bf16.msra.mxu1 %v2790_v15  ;;  %v2801_v15 = vld [vmem:[#allocation4 + $0x28] sm:$0xff]  }
 0xb31   : > { %2639 = vmatpush3.bf16.msra.mxu0 %v2789_v14  ;;  %2624 = vmatprep.subr.bf16.mxu1 %v3017_v2  ;;  %v2800_v14 = vld [vmem:[#allocation4 + $0x30] sm:$0xff]  }
 0xb32   : > { %2640 = vmatprep.subr.bf16.mxu0 %v3017_v2 }
 0xb34   : > { %2625 = vmatpush3.bf16.msra.mxu1 %v2792_v17 }
 0xb35   : > { %2641 = vmatpush3.bf16.msra.mxu0 %v2791_v16  ;;  %2626 = vmatprep.subr.bf16.mxu1 %v3017_v2  ;;  %v2802_v16 = vld [vmem:[#allocation4 + $0x20] sm:$0xff]  }
 0xb36   : > { %2658 = vmatprep.subr.bf16.mxu0 %v3017_v2 }
 0xb38   : > { %2627 = vmatpush3.bf16.msra.mxu1 %v2793_v20 }
 0xb39   : > { %2628 = vmatprep.subr.bf16.mxu1 %v3017_v2 }
 0xb3c   : > { %2629 = vmatpush3.bf16.msra.mxu1 %v2794_v21 }
 0xb3d   : > { %2646 = vmatprep.subr.bf16.mxu1 %v3017_v2 }
 0xbe8   : > { %v1290_v37 = vpop.f32.mrf.mxu0 }
 0xbe9   : > { %v1291_v38 = vadd.f32 %v3111_v9, %v1290_v37 }
 0xbea   : > { %v2620_v39 = vpop.f32.mrf.mxu0 }
 0xbeb   : > { %2871 = vtanh.f32 %v1291_v38  ;;  %v2376_v52 = vmul.f32 -1.442695, %v1291_v38 }
 0xbec   : > { %v1293_v40 = vpop.f32.mrf.mxu0 }
 0xbee   : > { %v2621_v41 = vpop.f32.mrf.mxu0 }
 0xbef   : > { %v1171_v42 = vpop.f32.mrf.mxu1 }
 0xbf0   : > { %v1172_v43 = vadd.f32 %v3143_v46, %v1171_v42 }
 0xbf1   : > { %v2608_v44 = vpop.f32.mrf.mxu1 }
 0xbf2   : > { %2873 = vtanh.f32 %v1172_v43  ;;  %v2369_v53 = vmul.f32 -1.442695, %v1172_v43 }
 0xbf3   : > { %v1174_v45 = vpop.f32.mrf.mxu1  ;;  %2875 = vpow2.f32 %v2376_v52 }
 0xbf4   : > { %2877 = vpow2.f32 %v2369_v53 }
 0xbf5   : > { %v2609_v47 = vpop.f32.mrf.mxu1 }
 0xbf8   : > { %v2872_v48 = vpop.eup %2871 }
 0xbf9   : > { %1310 = vrot.lane.b32.xlu1 %v2872_v48, %s3019_s10 }
 0xbfd   : > { %1305 = vrot.lane.b32.xlu1 %v1303_v49, %s3020_s11 }
 0xbff   : > { %v2874_v50 = vpop.eup %2873 }
 0xc00   : > { %1191 = vrot.lane.b32.xlu0 %v2874_v50, %s3019_s10  ;;  %v2876_v54 = vpop.eup %2875 }
 0xc01   : > { %v1299_v55 = vadd.f32 1.0, %v2876_v54  ;;  %v2878_v56 = vpop.eup %2877 }
 0xc02   : > { %v1180_v57 = vadd.f32 1.0, %v2878_v56 }
 0xc03   : > { %2879 = vrcp.f32 %v1299_v55 }
 0xc04   : > { %1186 = vrot.lane.b32.xlu0 %v1184_v51, %s3020_s11  ;;  %2881 = vrcp.f32 %v1180_v57 }
 0xc10   : > { %v2880_v58 = vpop.eup %2879 }
 0xc11   : > { %v2882_v61 = vpop.eup %2881 }
 0xc6b   : > { %v1311_v59 = vpop.permute.xlu1 %1310 }
 0xc6c   : > { %v1313_v60 = vmul.f32 %v2880_v58, %v1311_v59 }
 0xc6e   : > { %1315 = vrot.lane.b32.xlu1 %v1313_v60, %s3020_s11 }
 0xc6f   : > { %v1306_v0 = vpop.permute.xlu1 %1305 }
 0xc70   : > { %v1308_v1 = vmul.f32 %v2880_v58, %v1306_v0 }
 0xc72   : > { %v1192_v62 = vpop.permute.xlu0 %1191 }
 0xc73   : > { %v1194_v63 = vmul.f32 %v2882_v61, %v1192_v62 }
 0xc75   : > { %1196 = vrot.lane.b32.xlu0 %v1194_v63, %s3020_s11 }
 0xc76   : > { %v1187_v5 = vpop.permute.xlu0 %1186 }
 0xc77   : > { %v1189_v6 = vmul.f32 %v2882_v61, %v1187_v5  ;;  %v2795_v5 = vld [vmem:[#allocation4 + $0x18] sm:$0xff]  }
 0xce0   : > { %v1316_v3 = vpop.permute.xlu1 %1315 }
 0xce1   : > { %v1318_v4 = vadd.f32 %v1316_v3, %v1308_v1 }
 0xce3   : > { %2883 = vtanh.f32 %v1318_v4 }
 0xce7   : > { %v1197_v7 = vpop.permute.xlu0 %1196 }
 0xce8   : > { %v1199_v8 = vadd.f32 %v1197_v7, %v1189_v6  ;;  %v2796_v7 = vld [vmem:[#allocation4 + $0x10] sm:$0xff]  }
 0xcea   : > { %2885 = vtanh.f32 %v1199_v8 }
 0xcf0   : > { %v2884_v10 = vpop.eup %2883 }
 0xcf1   : > { %1321 = vrot.lane.b32.xlu1 %v2884_v10, %s3019_s10  ;;  %v2799_v10 = vld [vmem:[#allocation4 + $0x38] sm:$0xff]  }
 0xcf7   : > { %v2886_v12 = vpop.eup %2885 }
 0xcf8   : > { %1202 = vrot.lane.b32.xlu0 %v2886_v12, %s3019_s10 }
 0xd63   : > { %v1322_v18 = vpop.permute.xlu1 %1321 }
 0xd64   : > { %v1324_v19 = vmul.f32 %v2880_v58, %v1322_v18 }
 0xd66   : > { %1331 = vrot.lane.b32.xlu1 %v1324_v19, %s3019_s10 }
 0xd6a   : > { %1207 = vrot.lane.b32.xlu1 %v1199_v8, %s3021_s12  ;;  %v1203_v22 = vpop.permute.xlu0 %1202  ;;  %v2797_v8 = vld [vmem:[#allocation4 + $0x8] sm:$0xff]  }
 0xd6b   : > { %v1205_v23 = vmul.f32 %v2882_v61, %v1203_v22 }
 0xd6d   : > { %1212 = vrot.lane.b32.xlu0 %v1205_v23, %s3019_s10 }
 0xd71   : > { %1335 = vrot.lane.b32.xlu0 %v1324_v19, %s3020_s11  ;;  %v2396_v19 = vld [vmem:[%s3089_s7 + $0xc] sm:$0x3] }
 0xd75   : > { %1326 = vrot.lane.b32.xlu0 %v1318_v4, %s3021_s12 }
 0xdd8   : > { %v1332_v25 = vpop.permute.xlu1 %1331 }
 0xdd9   : > { %1334 = vst.msk [vmem:[#allocation2] sm:$0x3] %vm374_vm6, %v1332_v25 }
 0xdda   : > { %1457 = vst.msk [vmem:[#allocation2] sm:$0x3] %vm255_vm3, %v2383_v24 }
 0xddc   : > { %v1208_v26 = vpop.permute.xlu1 %1207 }
 0xddd   : > { %1210 = vst.msk [vmem:[#allocation3 + $0x2] sm:$0x3] %vm368_vm5, %v1208_v26 }
 0xddf   : > { %v1213_v27 = vpop.permute.xlu0 %1212 }
 0xde0   : > { %1215 = vst.msk [vmem:[#allocation2 + $0x2] sm:$0x3] %vm374_vm6, %v1213_v27 }
 0xde1   : > { %v1458_v28 = vld [vmem:[#allocation2] sm:$0x3] }
 0xde2   : > { %v1459_v29 = vpack.c.bf16 %v1458_v28, %v1458_v28 }
 0xde3   : > { %v1336_v30 = vpop.permute.xlu0 %1335 }
 0xde4   : > { %2643 = vmatmul.mubr.msk.bf16.vlgmr.msra.gmra.mxu0 %vm291_vm4, %v1459_v29  ;;  %1338 = vst.msk [vmem:[#allocation2 + $0x2] sm:$0x3] %vm368_vm5, %v1336_v30  ;;  %v3328_v30 = vld [vmem:[%s3428_s2] ss:$0 sm:$0xff] }
 0xde5   : > { %2666 = vmatprep.mubr.msk.bf16.mxu0 %vm3018_vm2, %v3017_v2  ;;  %2659 = vmatpush3.bf16.msra.mxu0 %v2795_v5  ;;  %v2805_v5 = vld [vmem:[#allocation4 + $0x8] sm:$0xff]  }
 0xde6   : > { %2660 = vmatprep.subr.bf16.mxu0 %v3017_v2 }
 0xde7   : > { %v1327_v31 = vpop.permute.xlu0 %1326 }
 0xde8   : > { %1329 = vst.msk [vmem:[#allocation3] sm:$0x3] %vm368_vm5, %v1327_v31 }
 0xde9   : > { %2661 = vmatpush3.bf16.msra.mxu0 %v2796_v7 }
 0xdea   : > { %2662 = vmatprep.subr.bf16.mxu0 %v3017_v2 }
 0xdeb   : > { %v1339_v32 = vld [vmem:[#allocation2 + $0x2] sm:$0x3] }
 0xdec   : > { %v1340_v33 = vpack.c.bf16 %v1339_v32, %v1339_v32 }
 0xded   : > { %2663 = vmatpush3.bf16.msra.mxu0 %v2797_v8 }
 0xdee   : > { %2631 = vmatmul.mubr.msk.bf16.vlgmr.msra.gmra.mxu1 %vm291_vm4, %v1340_v33  ;;  %2664 = vmatprep.subr.bf16.mxu0 %v3017_v2 }
 0xdef   : > { %2654 = vmatprep.mubr.msk.bf16.mxu1 %vm3018_vm2, %v3017_v2  ;;  %v1542_v45 = vld [vmem:[#allocation3] sm:$0x3]  ;;  %2647 = vmatpush3.bf16.msra.mxu1 %v2799_v10 }
 0xdf0   : > { %2648 = vmatprep.subr.bf16.mxu1 %v3017_v2  ;;  %v2807_v10 = vld [vmem:[#allocation4 + $0x38] sm:$0xff]  }
 0xdf1   : > { %2665 = vmatpush3.bf16.msra.mxu0 %v2798_v11  ;;  %v2808_v11 = vld [vmem:[#allocation4 + $0x30] sm:$0xff]  }
 0xdf2   : > { %2682 = vmatprep.subr.bf16.mxu0 %v3017_v2 }
 0xdf3   : > { %2649 = vmatpush3.bf16.msra.mxu1 %v2800_v14 }
 0xdf4   : > { %2650 = vmatprep.subr.bf16.mxu1 %v3017_v2 }
 0xdf7   : > { %2651 = vmatpush3.bf16.msra.mxu1 %v2801_v15 }
 0xdf8   : > { %2652 = vmatprep.subr.bf16.mxu1 %v3017_v2 }
 0xdfb   : > { %2653 = vmatpush3.bf16.msra.mxu1 %v2802_v16  ;;  %v2409_v16 = vld [vmem:[%s3089_s7 + $0xe] sm:$0x3] }
 0xdfc   : > { %2670 = vmatprep.subr.bf16.mxu1 %v3017_v2 }
 0xea4   : > { %v1529_v34 = vpop.f32.mrf.mxu0 }
 0xea5   : > { %v1530_v35 = vadd.f32 %v3111_v9, %v1529_v34  ;;  %v1423_v9 = vld [vmem:[#allocation3 + $0x2] sm:$0x3] }
 0xea6   : > { %v2644_v36 = vpop.f32.mrf.mxu0 }
 0xea7   : > { %2887 = vtanh.f32 %v1530_v35  ;;  %v2389_v48 = vmul.f32 -1.442695, %v1530_v35 }
 0xea8   : > { %v1532_v37 = vpop.f32.mrf.mxu0 }
 0xea9   : > { %v3334_v37 = vld [vmem:[%s3428_s2 + $0x1] ss:$0 sm:$0xff] }
 0xeaa   : > { %v2645_v38 = vpop.f32.mrf.mxu0 }
 0xeae   : > { %v1410_v39 = vpop.f32.mrf.mxu1 }
 0xeaf   : > { %v1411_v40 = vadd.f32 %v3143_v46, %v1410_v39 }
 0xeb0   : > { %v2632_v41 = vpop.f32.mrf.mxu1 }
 0xeb1   : > { %2889 = vtanh.f32 %v1411_v40  ;;  %v2382_v49 = vmul.f32 -1.442695, %v1411_v40 }
 0xeb2   : > { %v1413_v43 = vpop.f32.mrf.mxu1  ;;  %2891 = vpow2.f32 %v2389_v48 }
 0xeb3   : > { %2893 = vpow2.f32 %v2382_v49 }
 0xeb4   : > { %v2888_v42 = vpop.eup %2887  ;;  %v2633_v44 = vpop.f32.mrf.mxu1 }
 0xeb5   : > { %1549 = vrot.lane.b32.xlu0 %v2888_v42, %s3019_s10 }
 0xeb9   : > { %1544 = vrot.lane.b32.xlu0 %v1542_v45, %s3020_s11 }
 0xebe   : > { %v2890_v47 = vpop.eup %2889 }
 0xebf   : > { %1430 = vrot.lane.b32.xlu1 %v2890_v47, %s3019_s10  ;;  %v2892_v46 = vpop.eup %2891 }
 0xec0   : > { %v1538_v50 = vadd.f32 1.0, %v2892_v46  ;;  %v2894_v51 = vpop.eup %2893 }
 0xec1   : > { %v1419_v52 = vadd.f32 1.0, %v2894_v51 }
 0xec2   : > { %2895 = vrcp.f32 %v1538_v50 }
 0xec3   : > { %1425 = vrot.lane.b32.xlu1 %v1423_v9, %s3020_s11  ;;  %2897 = vrcp.f32 %v1419_v52 }
 0xecf   : > { %v2896_v53 = vpop.eup %2895 }
 0xed0   : > { %v2898_v56 = vpop.eup %2897 }
 0xf27   : > { %v1550_v54 = vpop.permute.xlu0 %1549 }
 0xf28   : > { %v1552_v55 = vmul.f32 %v2896_v53, %v1550_v54 }
 0xf2a   : > { %1554 = vrot.lane.b32.xlu0 %v1552_v55, %s3020_s11 }
 0xf2b   : > { %v1545_v59 = vpop.permute.xlu0 %1544 }
 0xf2c   : > { %v1547_v60 = vmul.f32 %v2896_v53, %v1545_v59 }
 0xf31   : > { %v1431_v57 = vpop.permute.xlu1 %1430 }
 0xf32   : > { %v1433_v58 = vmul.f32 %v2898_v56, %v1431_v57 }
 0xf34   : > { %1435 = vrot.lane.b32.xlu1 %v1433_v58, %s3020_s11 }
 0xf35   : > { %v1426_v63 = vpop.permute.xlu1 %1425 }
 0xf36   : > { %v1428_v0 = vmul.f32 %v2898_v56, %v1426_v63 }
 0xf9c   : > { %v1555_v61 = vpop.permute.xlu0 %1554 }
 0xf9d   : > { %v1557_v62 = vadd.f32 %v1555_v61, %v1547_v60 }
 0xf9f   : > { %2899 = vtanh.f32 %v1557_v62 }
 0xfa6   : > { %v1436_v1 = vpop.permute.xlu1 %1435 }
 0xfa7   : > { %v1438_v3 = vadd.f32 %v1436_v1, %v1428_v0  ;;  %v2803_v1 = vld [vmem:[#allocation4 + $0x18] sm:$0xff]  }
 0xfa9   : > { %2901 = vtanh.f32 %v1438_v3 }
 0xfac   : > { %v2900_v4 = vpop.eup %2899 }
 0xfad   : > { %1560 = vrot.lane.b32.xlu0 %v2900_v4, %s3019_s10  ;;  %v2804_v4 = vld [vmem:[#allocation4 + $0x10] sm:$0xff]  }
 0xfb6   : > { %v2902_v6 = vpop.eup %2901 }
 0xfb7   : > { %1441 = vrot.lane.b32.xlu1 %v2902_v6, %s3019_s10  ;;  %v2806_v6 = vld [vmem:[#allocation4] sm:$0xff]  }
0x101f   : > { %v1561_v12 = vpop.permute.xlu0 %1560 }
0x1020   : > { %v1563_v13 = vmul.f32 %v2896_v53, %v1561_v12  ;;  %v2809_v12 = vld [vmem:[#allocation4 + $0x28] sm:$0xff]  }
0x1022   : > { %1570 = vrot.lane.b32.xlu0 %v1563_v13, %s3019_s10 }
0x1026   : > { %1446 = vrot.lane.b32.xlu0 %v1438_v3, %s3021_s12 }
0x1029   : > { %v1442_v17 = vpop.permute.xlu1 %1441 }
0x102a   : > { %v1444_v18 = vmul.f32 %v2898_v56, %v1442_v17 }
0x102c   : > { %1451 = vrot.lane.b32.xlu1 %v1444_v18, %s3019_s10 }
0x1030   : > { %1574 = vrot.lane.b32.xlu1 %v1563_v13, %s3020_s11  ;;  %v2810_v13 = vld [vmem:[#allocation4 + $0x20] sm:$0xff]  }
0x1034   : > { %1565 = vrot.lane.b32.xlu1 %v1557_v62, %s3021_s12 }
0x1094   : > { %v1571_v20 = vpop.permute.xlu0 %1570 }
0x1095   : > { %1573 = vst.msk [vmem:[#allocation2] sm:$0x3] %vm374_vm6, %v1571_v20 }
0x1096   : > { %1696 = vst.msk [vmem:[#allocation2] sm:$0x3] %vm255_vm3, %v2396_v19 }
0x1098   : > { %v1447_v21 = vpop.permute.xlu0 %1446 }
0x1099   : > { %1449 = vst.msk [vmem:[#allocation3 + $0x2] sm:$0x3] %vm368_vm5, %v1447_v21 }
0x109d   : > { %v1697_v22 = vld [vmem:[#allocation2] sm:$0x3] }
0x109e   : > { %v1698_v23 = vpack.c.bf16 %v1697_v22, %v1697_v22  ;;  %v1452_v24 = vpop.permute.xlu1 %1451 }
0x109f   : > { %1454 = vst.msk [vmem:[#allocation2 + $0x2] sm:$0x3] %vm374_vm6, %v1452_v24 }
0x10a0   : > { %2667 = vmatmul.mubr.msk.bf16.vlgmr.msra.gmra.mxu0 %vm291_vm4, %v1698_v23  ;;  %v1662_v44 = vld [vmem:[#allocation3 + $0x2] sm:$0x3] }
0x10a1   : > { %2690 = vmatprep.mubr.msk.bf16.mxu0 %vm3018_vm2, %v3017_v2  ;;  %2683 = vmatpush3.bf16.msra.mxu0 %v2803_v1  ;;  %v2812_v1 = vld [vmem:[#allocation4 + $0x30] sm:$0xff]  }
0x10a2   : > { %v1575_v25 = vpop.permute.xlu1 %1574  ;;  %2684 = vmatprep.subr.bf16.mxu0 %v3017_v2 }
0x10a3   : > { %1577 = vst.msk [vmem:[#allocation2 + $0x2] sm:$0x3] %vm368_vm5, %v1575_v25 }
0x10a5   : > { %2685 = vmatpush3.bf16.msra.mxu0 %v2804_v4  ;;  %v2814_v4 = vld [vmem:[#allocation4 + $0x20] sm:$0xff]  }
0x10a6   : > { %v1566_v26 = vpop.permute.xlu1 %1565  ;;  %2686 = vmatprep.subr.bf16.mxu0 %v3017_v2 }
0x10a7   : > { %1568 = vst.msk [vmem:[#allocation3] sm:$0x3] %vm368_vm5, %v1566_v26 }
0x10a9   : > { %2687 = vmatpush3.bf16.msra.mxu0 %v2805_v5 }
0x10aa   : > { %v1578_v27 = vld [vmem:[#allocation2 + $0x2] sm:$0x3]  ;;  %2688 = vmatprep.subr.bf16.mxu0 %v3017_v2 }
0x10ab   : > { %v1579_v28 = vpack.c.bf16 %v1578_v27, %v1578_v27 }
0x10ad   : > { %2655 = vmatmul.mubr.msk.bf16.vlgmr.msra.gmra.mxu1 %vm291_vm4, %v1579_v28  ;;  %2689 = vmatpush3.bf16.msra.mxu0 %v2806_v6 }
0x10ae   : > { %2678 = vmatprep.mubr.msk.bf16.mxu1 %vm3018_vm2, %v3017_v2  ;;  %v1781_v41 = vld [vmem:[#allocation3] sm:$0x3]  ;;  %2671 = vmatpush3.bf16.msra.mxu1 %v2807_v10 }
0x10af   : > { %2672 = vmatprep.subr.bf16.mxu1 %v3017_v2 }
0x10b2   : > { %2673 = vmatpush3.bf16.msra.mxu1 %v2808_v11 }
0x10b3   : > { %2674 = vmatprep.subr.bf16.mxu1 %v3017_v2 }
0x10b6   : > { %2675 = vmatpush3.bf16.msra.mxu1 %v2809_v12 }
0x10b7   : > { %2676 = vmatprep.subr.bf16.mxu1 %v3017_v2 }
0x10ba   : > { %2677 = vmatpush3.bf16.msra.mxu1 %v2810_v13 }
0x10bb   : > { %2694 = vmatprep.subr.bf16.mxu1 %v3017_v2 }
0x1160   : > { %v1768_v29 = vpop.f32.mrf.mxu0 }
0x1161   : > { %v1769_v31 = vadd.f32 %v3328_v30, %v1768_v29 }
0x1162   : > { %v2668_v32 = vpop.f32.mrf.mxu0 }
0x1163   : > { %2903 = vtanh.f32 %v1769_v31  ;;  %v2402_v45 = vmul.f32 -1.442695, %v1769_v31 }
0x1164   : > { %v1771_v33 = vpop.f32.mrf.mxu0 }
0x1166   : > { %v2669_v34 = vpop.f32.mrf.mxu0 }
0x116d   : > { %v1649_v35 = vpop.f32.mrf.mxu1 }
0x116e   : > { %v1650_v38 = vadd.f32 %v3334_v37, %v1649_v35 }
0x116f   : > { %v2656_v39 = vpop.f32.mrf.mxu1 }
0x1170   : > { %v2904_v36 = vpop.eup %2903  ;;  %2905 = vtanh.f32 %v1650_v38  ;;  %v2395_v47 = vmul.f32 -1.442695, %v1650_v38 }
0x1171   : > { %1788 = vrot.lane.b32.xlu1 %v2904_v36, %s3019_s10  ;;  %v1652_v40 = vpop.f32.mrf.mxu1  ;;  %2907 = vpow2.f32 %v2402_v45 }
0x1172   : > { %2909 = vpow2.f32 %v2395_v47 }
0x1173   : > { %v2657_v42 = vpop.f32.mrf.mxu1 }
0x1175   : > { %1783 = vrot.lane.b32.xlu1 %v1781_v41, %s3020_s11 }
0x117d   : > { %v2906_v43 = vpop.eup %2905 }
0x117e   : > { %1669 = vrot.lane.b32.xlu0 %v2906_v43, %s3019_s10  ;;  %v2908_v9 = vpop.eup %2907 }
0x117f   : > { %v1777_v48 = vadd.f32 1.0, %v2908_v9  ;;  %v2910_v49 = vpop.eup %2909 }
0x1180   : > { %v1658_v46 = vadd.f32 1.0, %v2910_v49 }
0x1181   : > { %2911 = vrcp.f32 %v1777_v48 }
0x1182   : > { %1664 = vrot.lane.b32.xlu0 %v1662_v44, %s3020_s11  ;;  %2913 = vrcp.f32 %v1658_v46 }
0x118e   : > { %v2912_v50 = vpop.eup %2911 }
0x118f   : > { %v2914_v53 = vpop.eup %2913 }
0x11e3   : > { %v1789_v51 = vpop.permute.xlu1 %1788 }
0x11e4   : > { %v1791_v52 = vmul.f32 %v2912_v50, %v1789_v51 }
0x11e6   : > { %1793 = vrot.lane.b32.xlu1 %v1791_v52, %s3020_s11 }
0x11e7   : > { %v1784_v56 = vpop.permute.xlu1 %1783 }
0x11e8   : > { %v1786_v57 = vmul.f32 %v2912_v50, %v1784_v56 }
0x11f0   : > { %v1670_v54 = vpop.permute.xlu0 %1669 }
0x11f1   : > { %v1672_v55 = vmul.f32 %v2914_v53, %v1670_v54 }
0x11f3   : > { %1674 = vrot.lane.b32.xlu0 %v1672_v55, %s3020_s11 }
0x11f4   : > { %v1665_v60 = vpop.permute.xlu0 %1664 }
0x11f5   : > { %v1667_v61 = vmul.f32 %v2914_v53, %v1665_v60 }
0x1258   : > { %v1794_v58 = vpop.permute.xlu1 %1793 }
0x1259   : > { %v1796_v59 = vadd.f32 %v1794_v58, %v1786_v57 }
0x125b   : > { %2915 = vtanh.f32 %v1796_v59 }
0x1265   : > { %v1675_v62 = vpop.permute.xlu0 %1674 }
0x1266   : > { %v1677_v0 = vadd.f32 %v1675_v62, %v1667_v61  ;;  %v2811_v62 = vld [vmem:[#allocation4 + $0x38] sm:$0xff]  }
0x1268   : > { %v2916_v63 = vpop.eup %2915  ;;  %2917 = vtanh.f32 %v1677_v0 }
0x1269   : > { %1799 = vrot.lane.b32.xlu1 %v2916_v63, %s3019_s10 }
0x1275   : > { %v2918_v3 = vpop.eup %2917 }
0x1276   : > { %1680 = vrot.lane.b32.xlu0 %v2918_v3, %s3019_s10  ;;  %v2813_v3 = vld [vmem:[#allocation4 + $0x28] sm:$0xff]  }
0x12db   : > { %v1800_v7 = vpop.permute.xlu1 %1799 }
0x12dc   : > { %v1802_v8 = vmul.f32 %v2912_v50, %v1800_v7 }
0x12de   : > { %1809 = vrot.lane.b32.xlu1 %v1802_v8, %s3019_s10 }
0x12e2   : > { %1685 = vrot.lane.b32.xlu1 %v1677_v0, %s3021_s12 }
0x12e8   : > { %v1681_v14 = vpop.permute.xlu0 %1680 }
0x12e9   : > { %v1683_v15 = vmul.f32 %v2914_v53, %v1681_v14 }
0x12eb   : > { %1690 = vrot.lane.b32.xlu0 %v1683_v15, %s3019_s10 }
0x12ef   : > { %1813 = vrot.lane.b32.xlu0 %v1802_v8, %s3020_s11 }
0x12f3   : > { %1804 = vrot.lane.b32.xlu0 %v1796_v59, %s3021_s12 }
0x1350   : > { %v1810_v17 = vpop.permute.xlu1 %1809 }
0x1351   : > { %1812 = vst.msk [vmem:[#allocation2] sm:$0x3] %vm374_vm6, %v1810_v17 }
0x1352   : > { %1935 = vst.msk [vmem:[#allocation2] sm:$0x3] %vm255_vm3, %v2409_v16 }
0x1354   : > { %v1686_v18 = vpop.permute.xlu1 %1685 }
0x1355   : > { %1688 = vst.msk [vmem:[#allocation3 + $0x2] sm:$0x3] %vm368_vm5, %v1686_v18 }
0x1359   : > { %v1936_v19 = vld [vmem:[#allocation2] sm:$0x3] }
0x135a   : > { %v1937_v20 = vpack.c.bf16 %v1936_v19, %v1936_v19 }
0x135c   : > { %2691 = vmatmul.mubr.msk.bf16.vlgmr.msra.gmra.mxu0 %vm291_vm4, %v1937_v20 }
0x135d   : > { %v1691_v21 = vpop.permute.xlu0 %1690 }
0x135e   : > { %1693 = vst.msk [vmem:[#allocation2 + $0x2] sm:$0x3] %vm374_vm6, %v1691_v21 }
0x1361   : > { %v1814_v22 = vpop.permute.xlu0 %1813 }
0x1362   : > { %1816 = vst.msk [vmem:[#allocation2 + $0x2] sm:$0x3] %vm368_vm5, %v1814_v22 }
0x1365   : > { %v1805_v23 = vpop.permute.xlu0 %1804 }
0x1366   : > { %1807 = vst.msk [vmem:[#allocation3] sm:$0x3] %vm368_vm5, %v1805_v23 }
0x1369   : > { %v1817_v24 = vld [vmem:[#allocation2 + $0x2] sm:$0x3] }
0x136a   : > { %v1818_v25 = vpack.c.bf16 %v1817_v24, %v1817_v24 }
0x136c   : > { %2679 = vmatmul.mubr.msk.bf16.vlgmr.msra.gmra.mxu1 %vm291_vm4, %v1818_v25 }
0x136d   : > { %2702 = vmatprep.mubr.msk.bf16.mxu1 %vm3018_vm2, %v3017_v2  ;;  %v2020_v36 = vld [vmem:[#allocation3] sm:$0x3]  ;;  %2695 = vmatpush3.bf16.msra.mxu1 %v2811_v62 }
0x136e   : > { %2696 = vmatprep.subr.bf16.mxu1 %v3017_v2 }
0x1371   : > { %2697 = vmatpush3.bf16.msra.mxu1 %v2812_v1 }
0x1372   : > { %2698 = vmatprep.subr.bf16.mxu1 %v3017_v2 }
0x1375   : > { %2699 = vmatpush3.bf16.msra.mxu1 %v2813_v3 }
0x1376   : > { %2700 = vmatprep.subr.bf16.mxu1 %v3017_v2 }
0x1379   : > { %2701 = vmatpush3.bf16.msra.mxu1 %v2814_v4 }
0x141c   : > { %v2007_v26 = vpop.f32.mrf.mxu0 }
0x141d   : > { %v2008_v27 = vadd.f32 %v3328_v30, %v2007_v26  ;;  %v1901_v30 = vld [vmem:[#allocation3 + $0x2] sm:$0x3] }
0x141e   : > { %v2692_v28 = vpop.f32.mrf.mxu0 }
0x141f   : > { %2919 = vtanh.f32 %v2008_v27  ;;  %v2415_v41 = vmul.f32 -1.442695, %v2008_v27 }
0x1420   : > { %v2010_v29 = vpop.f32.mrf.mxu0 }
0x1422   : > { %v2693_v31 = vpop.f32.mrf.mxu0 }
0x142c   : > { %v2920_v32 = vpop.eup %2919  ;;  %v1888_v33 = vpop.f32.mrf.mxu1 }
0x142d   : > { %2027 = vrot.lane.b32.xlu0 %v2920_v32, %s3019_s10  ;;  %v1889_v34 = vadd.f32 %v3334_v37, %v1888_v33 }
0x142e   : > { %v2680_v35 = vpop.f32.mrf.mxu1 }
0x142f   : > { %2921 = vtanh.f32 %v1889_v34  ;;  %v2408_v43 = vmul.f32 -1.442695, %v1889_v34 }
0x1430   : > { %v1891_v38 = vpop.f32.mrf.mxu1  ;;  %2923 = vpow2.f32 %v2415_v41 }
0x1431   : > { %2022 = vrot.lane.b32.xlu0 %v2020_v36, %s3020_s11  ;;  %2925 = vpow2.f32 %v2408_v43 }
0x1432   : > { %v2681_v39 = vpop.f32.mrf.mxu1 }
0x143c   : > { %v2922_v40 = vpop.eup %2921 }
0x143d   : > { %1908 = vrot.lane.b32.xlu1 %v2922_v40, %s3019_s10  ;;  %v2924_v42 = vpop.eup %2923 }
0x143e   : > { %v2016_v44 = vadd.f32 1.0, %v2924_v42  ;;  %v2926_v45 = vpop.eup %2925 }
0x143f   : > { %v1897_v49 = vadd.f32 1.0, %v2926_v45 }
0x1440   : > { %2927 = vrcp.f32 %v2016_v44 }
0x1441   : > { %1903 = vrot.lane.b32.xlu1 %v1901_v30, %s3020_s11  ;;  %2929 = vrcp.f32 %v1897_v49 }
0x144d   : > { %v2928_v47 = vpop.eup %2927 }
0x144e   : > { %v2930_v46 = vpop.eup %2929 }
0x149f   : > { %v2028_v9 = vpop.permute.xlu0 %2027 }
0x14a0   : > { %v2030_v48 = vmul.f32 %v2928_v47, %v2028_v9 }
0x14a2   : > { %2032 = vrot.lane.b32.xlu0 %v2030_v48, %s3020_s11 }
0x14a3   : > { %v2023_v52 = vpop.permute.xlu0 %2022 }
0x14a4   : > { %v2025_v53 = vmul.f32 %v2928_v47, %v2023_v52 }
0x14af   : > { %v1909_v50 = vpop.permute.xlu1 %1908 }
0x14b0   : > { %v1911_v51 = vmul.f32 %v2930_v46, %v1909_v50 }
0x14b2   : > { %1913 = vrot.lane.b32.xlu1 %v1911_v51, %s3020_s11 }
0x14b3   : > { %v1904_v56 = vpop.permute.xlu1 %1903 }
0x14b4   : > { %v1906_v58 = vmul.f32 %v2930_v46, %v1904_v56 }
0x1514   : > { %v2033_v54 = vpop.permute.xlu0 %2032 }
0x1515   : > { %v2035_v55 = vadd.f32 %v2033_v54, %v2025_v53 }
0x1517   : > { %2931 = vtanh.f32 %v2035_v55 }
0x1524   : > { %v2932_v57 = vpop.eup %2931  ;;  %v1914_v59 = vpop.permute.xlu1 %1913 }
0x1525   : > { %2038 = vrot.lane.b32.xlu0 %v2932_v57, %s3019_s10  ;;  %v1916_v60 = vadd.f32 %v1914_v59, %v1906_v58 }
0x1527   : > { %2933 = vtanh.f32 %v1916_v60 }
0x1534   : > { %v2934_v61 = vpop.eup %2933 }
0x1535   : > { %1919 = vrot.lane.b32.xlu1 %v2934_v61, %s3019_s10 }
0x1597   : > { %v2039_v63 = vpop.permute.xlu0 %2038 }
0x1598   : > { %v2041_v0 = vmul.f32 %v2928_v47, %v2039_v63 }
0x159a   : > { %2052 = vrot.lane.b32.xlu0 %v2041_v0, %s3020_s11 }
0x15a7   : > { %v1920_v5 = vpop.permute.xlu1 %1919 }
0x15a8   : > { %v1922_v6 = vmul.f32 %v2930_v46, %v1920_v5 }
0x15aa   : > { %1929 = vrot.lane.b32.xlu1 %v1922_v6, %s3019_s10 }
0x15ae   : > { %1924 = vrot.lane.b32.xlu1 %v1916_v60, %s3021_s12 }
0x160c   : > { %v2053_v8 = vpop.permute.xlu0 %2052 }
0x161c   : > { %v1930_v7 = vpop.permute.xlu1 %1929 }
0x161d   : > { %1932 = vst.msk [vmem:[#allocation2 + $0x2] sm:$0x3] %vm374_vm6, %v1930_v7 }
0x161e   : > { %2055 = vst.msk [vmem:[#allocation2 + $0x2] sm:$0x3] %vm368_vm5, %v2053_v8 }
0x1620   : > { %v1925_v10 = vpop.permute.xlu1 %1924 }
0x1621   : > { %1927 = vst.msk [vmem:[#allocation3 + $0x2] sm:$0x3] %vm368_vm5, %v1925_v10 }
0x1625   : > { %v2056_v11 = vld [vmem:[#allocation2 + $0x2] sm:$0x3] }
0x1626   : > { %v2057_v12 = vpack.c.bf16 %v2056_v11, %v2056_v11 }
0x1628   : > { %2703 = vmatmul.mubr.msk.bf16.vlgmr.msra.gmra.mxu1 %vm291_vm4, %v2057_v12  ;;  %v2140_v2 = vld [vmem:[#allocation3 + $0x2] sm:$0x3] }
0x1629   : > { %2142 = vrot.lane.b32.xlu1 %v2140_v2, %s3020_s11 }
0x16e8   : > { %v2127_v13 = vpop.f32.mrf.mxu1 }
0x16e9   : > { %v2128_v14 = vadd.f32 %v3334_v37, %v2127_v13  ;;  %v2143_v37 = vpop.permute.xlu1 %2142 }
0x16ea   : > { %v2704_v15 = vpop.f32.mrf.mxu1 }
0x16eb   : > { %2935 = vtanh.f32 %v2128_v14  ;;  %v2421_v19 = vmul.f32 -1.442695, %v2128_v14 }
0x16ec   : > { %v2130_v16 = vpop.f32.mrf.mxu1 }
0x16ed   : > { %2937 = vpow2.f32 %v2421_v19 }
0x16ee   : > { %v2705_v17 = vpop.f32.mrf.mxu1 }
0x16f8   : > { %v2936_v18 = vpop.eup %2935 }
0x16f9   : > { %2147 = vrot.lane.b32.xlu0 %v2936_v18, %s3019_s10 }
0x16fa   : > { %v2938_v20 = vpop.eup %2937 }
0x16fb   : > { %v2136_v21 = vadd.f32 1.0, %v2938_v20 }
0x16fd   : > { %2939 = vrcp.f32 %v2136_v21 }
0x170a   : > { %v2940_v22 = vpop.eup %2939 }
0x170b   : > { %v2145_v25 = vmul.f32 %v2940_v22, %v2143_v37 }
0x176b   : > { %v2148_v23 = vpop.permute.xlu0 %2147 }
0x176c   : > { %v2150_v24 = vmul.f32 %v2940_v22, %v2148_v23 }
0x176e   : > { %2152 = vrot.lane.b32.xlu0 %v2150_v24, %s3020_s11 }
0x1772   : > { %2043 = vrot.lane.b32.xlu0 %v2035_v55, %s3021_s12 }
0x17e0   : > { %v2153_v26 = vpop.permute.xlu0 %2152 }
0x17e1   : > { %v2155_v27 = vadd.f32 %v2153_v26, %v2145_v25 }
0x17e3   : > { %2941 = vtanh.f32 %v2155_v27  ;;  %2163 = vrot.lane.b32.xlu0 %v2155_v27, %s3021_s12 }
0x17e4   : > { %v2044_v28 = vpop.permute.xlu0 %2043 }
0x17e5   : > { %2046 = vst.msk [vmem:[#allocation3] sm:$0x3] %vm368_vm5, %v2044_v28 }
0x17f0   : > { %v2942_v29 = vpop.eup %2941 }
0x17f1   : > { %2158 = vrot.lane.b32.xlu1 %v2942_v29, %s3019_s10 }
0x17f5   : > { %2048 = vrot.lane.b32.xlu1 %v2041_v0, %s3019_s10 }
0x1855   : > { %v2164_v31 = vpop.permute.xlu0 %2163 }
0x1856   : > { %2166 = vst.msk [vmem:[#allocation3 + $0x2] sm:$0x3] %vm368_vm5, %v2164_v31 }
0x1863   : > { %v2159_v32 = vpop.permute.xlu1 %2158 }
0x1864   : > { %v2161_v33 = vmul.f32 %v2940_v22, %v2159_v32 }
0x1866   : > { %2168 = vrot.lane.b32.xlu1 %v2161_v33, %s3019_s10 }
0x1867   : > { %v2049_v34 = vpop.permute.xlu1 %2048 }
0x1868   : > { %2051 = vst.msk [vmem:[#allocation2] sm:$0x3] %vm374_vm6, %v2049_v34 }
0x18d5   : > { %2175 = sbr.rel (%p2422_p2) target bundleno = 6685 (0x1a1d), region = 52 }
0x18d8   : > { %v2169_v35 = vpop.permute.xlu1 %2168 }
0x18d9   : > { %2171 = vst.msk [vmem:[#allocation2 + $0x2] sm:$0x3] %vm374_vm6, %v2169_v35 }
0x18da   : > { %v3022_v39 = vmov 0.0   ;;  %v2945_v40 = vld [vmem:[%s3429_s3 + $0x8] sm:$0xff]   ;;  %vm3023_vm7 = vmmov 0   ;;  %v2946_v30 = vld [vmem:[%s3429_s3] sm:$0xff]   ;;  %vm2204_vm8 = vcmask 261120  }
0x18db   : > { %2706 = vmatprep.subr.bf16.mxu0 %v3022_v39  ;;  %2710 = vmatprep.mubr.msk.bf16.mxu0 %vm3023_vm7, %v3022_v39  ;;  %v2423_v42 = vld [vmem:[%s3430_s4] ss:$0 sm:$0xff] }
0x18dc   : > { %2707 = vmatpush3.bf16.msra.mxu0 %v2945_v40 }
0x18dd   : > { %2708 = vmatprep.subr.bf16.mxu0 %v3022_v39 }
0x18e0   : > { %v2176_v36 = vld [vmem:[#allocation2 + $0x2] sm:$0x3]  ;;  %2709 = vmatpush3.bf16.msra.mxu0 %v2946_v30 }
0x18e1   : > { %v2177_v38 = vpack.c.bf16 %v2176_v36, %v2176_v36 }
0x18e3   : > { %2190 = vrot.lane.b32.xlu0 %v2177_v38, %s3024_s23 }
0x1955   : > { %v2191_v41 = vpop.permute.xlu0 %2190 }
0x1956   : > { %2711 = vmatmul.mubr.msk.bf16.vlgmr.msra.gmra.mxu0 %vm2204_vm8, %v2191_v41 }
0x1a16   : > { %v2242_v43 = vpop.f32.mrf.mxu0 }
0x1a17   : > { %v2243_v44 = vadd.f32 %v2423_v42, %v2242_v43 }
0x1a18   : > { %v2712_v45 = vpop.f32.mrf.mxu0 }
0x1a19   : > { %2248 = vst [vmem:[#allocation7] sm:$0x3] %v2243_v44 }
0x1a1a   : > { %v2245_v47 = vpop.f32.mrf.mxu0 }
0x1a1c   : > { %v2713_v9 = vpop.f32.mrf.mxu0 }
0x1a1d PF: > { %p2728_p3 = scmp.eq.s32.totalorder %s3062_s19, 1  ;;  %s3025_s28 = smov [#allocation7]  }
0x1a1e   : > { %s2256_s29 = sshll.u32 %s3025_s28, 4  ;;  %s2257_s29 = int_to_ptr.vmem [resolvable:$true] %s2256_s29 }
0x1a1f   : > { %s2973_s30 = scalar_lea.vmem %s2257_s29, 32  ;;  %p2980_p7 = scmp.lt.s32.totalorder %s2257_s29, %s2257_s29 }
0x1a20   : > { %p2974_p4 = scmp.ne.s32.totalorder %s2257_s29, %s2973_s30  ;;  %p2981_p8 = scmp.lt.s32.totalorder %s2973_s30, %s2973_s30 }
0x1a22   : > { %p2975_p5 = pnand %p2974_p4, %p2728_p3  ;;  %p2982_p9 = por %p2981_p8, %p2980_p7 }
0x1a24   : > { %p2976_p6 = pneg %p2975_p5 }
0x1a26   : > { %p2983_p10 = pnand %p2982_p9, %p2976_p6 }
0x1a28   : > { %2986 = shalt.err (!%p2983_p10)
}
0x1a29   : > { %2719 = dma.vmem_to_hbm [thread:$0]  (%p2728_p3), %s2257_s29, 32, %s3431_s5, [#allocation6]  }
0x1a2a   : > { %3006 = dma.done.wait (%p2728_p3), [#allocation6], 32  }
0x1a2b   : > { %3008 = vsyncadd (%p2728_p3), [#allocation6], 4294967264 }
0x1a2c PF: > { %s17_s18 = sadd.s32 1, %s3011_s18  }
0x1a2d   : > { %p14_p11 = scmp.ge.s32.totalorder %s17_s18, 4  }
0x1a2f   :  { %16 = sbr.rel (!%p14_p11) target bundleno = 2 (0x2), region = 91 }
0x1a34   :  { %2269 = vsyncpa [#allocation5], 1 }
0x1a35   :  { %2271 = vsyncpa [#allocation5 + $0x1], 1 }
0x1a36   :  { %2272 = vsyncpa [#allocation6], 1 }
0x1a37   :  { %2274 = vsyncpa [#allocation6 + $0x1], 1 }

</bundles_post_ra>
